<compile_context>
chip_gen: v7x
topology: tpu7x:2x2x1
jax: 0.10.0
libtpu: 0.0.40
codegen_flags: <defaults>
</compile_context>

<pallas_src>
import jax
import jax.numpy as jnp
import numpy as np
from jax import lax
from jax.experimental import pallas as pl
from jax.experimental.pallas import tpu as pltpu

KS = 3
BN_EPS = 1e-5                      # torch BatchNorm2d default eps
LANE = 128
_VMEM_LIMIT = 48 * 1024 * 1024     # < v7x 64 MiB physical VMEM; fine on v5e/v6e


def _round_up(x, m):
    return (x + m - 1) // m * m


def _pick_row_tile(h, w, max_rows=8):
    """Output rows per pass-1 grid step.

    Keep w a multiple of 8 friendly: the (th, w, cin) -> (th*w, cin) reshape
    inside the kernel is a clean leading-dim collapse when w % 8 == 0; the
    M tile (th*w) must be a multiple of 8 for the (8,128) block rule.
    """
    for th in range(min(h, max_rows), 0, -1):
        if h % th == 0 and (th * w) % 8 == 0:
            return th
    return 1


def _pick_m_tile(m, cap=1024):
    """Pass-2 M tile: largest divisor of m <= cap that is a multiple of 8."""
    for d in range(min(m, cap), 0, -1):
        if m % d == 0 and d % 8 == 0:
            return d
    return m   # full extent is always legal


@jax.jit
def conv_bn_relu(x_nchw, w_oihw, gamma, beta):
    """x_nchw: (N, Cin, H, W); w_oihw: (Cout, Cin, 3, 3). stride=1, padding=1."""
    n, cin, h, w = x_nchw.shape
    cout = w_oihw.shape[0]
    hp, wp = h + 2, w + 2
    cout_pad = _round_up(cout, LANE)
    th = _pick_row_tile(h, w)
    num_row_tiles = h // th
    tm = th * w                      # rows of the (M, Cout_pad) output per tile
    m = n * h * w

    # ---- layout prep (plain JAX; one copy of the activation, no im2col) ----
    x_nhwc = jnp.transpose(x_nchw, (0, 2, 3, 1))
    x_pad = jnp.pad(x_nhwc, ((0, 0), (1, 1), (1, 1), (0, 0))).astype(jnp.bfloat16)
    # weights OIHW -> (kh, kw, cin, cout) -> (9*cin, cout_pad), bf16 MXU operand
    w_mat = jnp.transpose(w_oihw, (2, 3, 1, 0)).reshape(KS * KS * cin, cout)
    w_mat = jnp.pad(w_mat, ((0, 0), (0, cout_pad - cout))).astype(jnp.bfloat16)
    gamma_p = jnp.pad(gamma.astype(jnp.float32), (0, cout_pad - cout))
    beta_p = jnp.pad(beta.astype(jnp.float32), (0, cout_pad - cout))

    # ---- pass 1: conv (one K=9*Cin matmul per tile) + per-tile BN stats ----
    def conv_stats_kernel(x_ref, w_ref, out_ref, stats_ref):
        # x_ref:     (1, hp, wp, cin)   padded image, resident across row tiles
        # w_ref:     (9*cin, cout_pad)  bf16 weights (resident)
        # out_ref:   (tm, cout_pad)     f32 conv output tile (lane-dense)
        # stats_ref: (1, 2, cout_pad)   per-tile [sum ; sum of squares]
        t = pl.program_id(1)
        r0 = pl.multiple_of(t * th, th)        # first output row of this tile
        taps = []
        for kh in range(KS):
            for kw_ in range(KS):
                blk = x_ref[0, pl.ds(r0 + kh, th), pl.ds(kw_, w), :]  # (th,w,cin)
                taps.append(blk.reshape(tm, cin))
        # (tm, 9*cin): the 3x3 taps folded into the contraction dimension.
        patch = taps[0] if len(taps) == 1 else jnp.concatenate(taps, axis=-1)
        acc = jnp.dot(patch, w_ref[...], preferred_element_type=jnp.float32)
        out_ref[...] = acc
        # Per-channel partial sums (XLU); reduced globally in the wrapper.
        stats_ref[0, 0:1, :] = jnp.sum(acc, axis=0, keepdims=True)
        stats_ref[0, 1:2, :] = jnp.sum(acc * acc, axis=0, keepdims=True)

    conv_out, stats = pl.pallas_call(
        conv_stats_kernel,
        grid=(n, num_row_tiles),
        in_specs=[
            pl.BlockSpec((1, hp, wp, cin), lambda b, t: (b, 0, 0, 0)),
            pl.BlockSpec((KS * KS * cin, cout_pad), lambda b, t: (0, 0)),
        ],
        out_specs=[
            pl.BlockSpec((tm, cout_pad),
                         lambda b, t: (b * num_row_tiles + t, 0)),
            pl.BlockSpec((1, 2, cout_pad),
                         lambda b, t: (b * num_row_tiles + t, 0, 0)),
        ],
        out_shape=[
            jax.ShapeDtypeStruct((m, cout_pad), jnp.float32),
            jax.ShapeDtypeStruct((n * num_row_tiles, 2, cout_pad), jnp.float32),
        ],
        compiler_params=pltpu.CompilerParams(
            dimension_semantics=("parallel", "parallel"),
            vmem_limit_bytes=_VMEM_LIMIT),
    )(x_pad, w_mat)

    # ---- global batch statistics (tiny Cout-sized math, plain JAX, f32) ----
    sums = jnp.sum(stats[:, 0, :], axis=0)
    sumsq = jnp.sum(stats[:, 1, :], axis=0)
    mean = sums / m
    var = jnp.maximum(sumsq / m - mean * mean, 0.0)   # biased var (train-mode BN)
    inv = lax.rsqrt(var + BN_EPS)
    scale = (gamma_p * inv).reshape(1, cout_pad)
    bias = (beta_p - mean * gamma_p * inv).reshape(1, cout_pad)

    # ---- pass 2: normalize + ReLU, in place, on a 'parallel' M grid ----
    def bn_relu_kernel(y_ref, s_ref, b_ref, o_ref):
        o_ref[...] = jnp.maximum(y_ref[...] * s_ref[...] + b_ref[...], 0.0)

    tm2 = _pick_m_tile(m)
    out_flat = pl.pallas_call(
        bn_relu_kernel,
        grid=(m // tm2,),
        in_specs=[
            pl.BlockSpec((tm2, cout_pad), lambda i: (i, 0)),
            pl.BlockSpec((1, cout_pad), lambda i: (0, 0)),
            pl.BlockSpec((1, cout_pad), lambda i: (0, 0)),
        ],
        out_specs=pl.BlockSpec((tm2, cout_pad), lambda i: (i, 0)),
        out_shape=jax.ShapeDtypeStruct((m, cout_pad), jnp.float32),
        input_output_aliases={0: 0},    # normalize the conv buffer in place
        compiler_params=pltpu.CompilerParams(
            dimension_semantics=("parallel",),
            vmem_limit_bytes=_VMEM_LIMIT),
    )(conv_out, scale, bias)

    out = out_flat[:, :cout].reshape(n, h, w, cout)
    return jnp.transpose(out, (0, 3, 1, 2))            # back to NCHW


def _reference(x_nchw, w_oihw, gamma, beta):
    feat = lax.conv_general_dilated(
        x_nchw.astype(jnp.float32), w_oihw.astype(jnp.float32),
        window_strides=(1, 1), padding=((1, 1), (1, 1)),
        dimension_numbers=("NCHW", "OIHW", "NCHW"))
    mean = jnp.mean(feat, axis=(0, 2, 3), keepdims=True)
    var = jnp.mean((feat - mean) ** 2, axis=(0, 2, 3), keepdims=True)
    y = (feat - mean) * lax.rsqrt(var + BN_EPS)
    y = y * gamma.reshape(1, -1, 1, 1) + beta.reshape(1, -1, 1, 1)
    return jnp.maximum(y, 0.0)


if __name__ == "__main__":
    N, CIN, COUT, H, W = 2, 4, 8, 16, 16
    key = jax.random.PRNGKey(0)
    kx, kw = jax.random.split(key)
    x = jax.random.normal(kx, (N, CIN, H, W), dtype=jnp.float32)
    # Conv2d default init (kaiming_uniform, a=sqrt(5)) -> U(-1/sqrt(fan_in), 1/sqrt(fan_in))
    fan_in = CIN * KS * KS
    bound = 1.0 / np.sqrt(fan_in)
    weight = jax.random.uniform(kw, (COUT, CIN, KS, KS), jnp.float32, -bound, bound)
    gamma = jnp.ones((COUT,), jnp.float32)   # BatchNorm2d init: weight = 1
    beta = jnp.zeros((COUT,), jnp.float32)   # BatchNorm2d init: bias = 0

    out = jax.block_until_ready(conv_bn_relu(x, weight, gamma, beta))
    ref = jax.block_until_ready(_reference(x, weight, gamma, beta))
    assert out.shape == (N, COUT, H, W)
    # bf16 MXU operands in the kernel path -> loosened tolerance vs f32 reference.
    np.testing.assert_allclose(np.asarray(out), np.asarray(ref), rtol=5e-2, atol=5e-2)
    print("KERNEL_OK")
</pallas_src>

<mosaic_0001>
module attributes {stable_mosaic.version = 11 : i64} {
  func.func @conv_stats_kernel(%arg0: i32, %arg1: i32, %arg2: memref<1x18x18x4xbf16, #tpu.memory_space<vmem>>, %arg3: memref<36x128xbf16, #tpu.memory_space<vmem>>, %arg4: memref<128x128xf32, #tpu.memory_space<vmem>>, %arg5: memref<1x2x128xf32, #tpu.memory_space<vmem>>) attributes {dimension_semantics = [#tpu.dimension_semantics<parallel>, #tpu.dimension_semantics<parallel>], iteration_bounds = array<i64: 2, 2>, scalar_prefetch = 0 : i64, scratch_operands = 0 : i64, tpu.core_type = #tpu.core_type<tc>, window_params = [{transform_indices = @transform_0, window_bounds = array<i64: 1, 18, 18, 4>}, {pipeline_mode = #tpu.pipeline_mode<synchronous>, transform_indices = @transform_1, window_bounds = array<i64: 36, 128>}, {transform_indices = @transform_2, window_bounds = array<i64: 128, 128>}, {transform_indices = @transform_3, window_bounds = array<i64: 1, 2, 128>}]} {
    %c8_i32 = arith.constant 8 : i32
    %0 = arith.muli %arg1, %c8_i32 : i32
    %1 = tpu.assume_multiple %0, 8 : i32
    %c0_i32 = arith.constant 0 : i32
    %2 = arith.addi %1, %c0_i32 : i32
    %c0 = arith.constant 0 : index
    %3 = arith.index_cast %2 : i32 to index
    %c0_0 = arith.constant 0 : index
    %c0_1 = arith.constant 0 : index
    %4 = vector.load %arg2[%c0, %3, %c0_0, %c0_1] : memref<1x18x18x4xbf16, #tpu.memory_space<vmem>>, vector<1x8x16x4xbf16>
    %5 = vector.shape_cast %4 : vector<1x8x16x4xbf16> to vector<8x16x4xbf16>
    %6 = vector.shape_cast %5 : vector<8x16x4xbf16> to vector<128x4xbf16>
    %c0_i32_2 = arith.constant 0 : i32
    %7 = arith.addi %1, %c0_i32_2 : i32
    %c0_3 = arith.constant 0 : index
    %8 = arith.index_cast %7 : i32 to index
    %c1 = arith.constant 1 : index
    %c0_4 = arith.constant 0 : index
    %9 = vector.load %arg2[%c0_3, %8, %c1, %c0_4] : memref<1x18x18x4xbf16, #tpu.memory_space<vmem>>, vector<1x8x16x4xbf16>
    %10 = vector.shape_cast %9 : vector<1x8x16x4xbf16> to vector<8x16x4xbf16>
    %11 = vector.shape_cast %10 : vector<8x16x4xbf16> to vector<128x4xbf16>
    %c0_i32_5 = arith.constant 0 : i32
    %12 = arith.addi %1, %c0_i32_5 : i32
    %c0_6 = arith.constant 0 : index
    %13 = arith.index_cast %12 : i32 to index
    %c2 = arith.constant 2 : index
    %c0_7 = arith.constant 0 : index
    %14 = vector.load %arg2[%c0_6, %13, %c2, %c0_7] : memref<1x18x18x4xbf16, #tpu.memory_space<vmem>>, vector<1x8x16x4xbf16>
    %15 = vector.shape_cast %14 : vector<1x8x16x4xbf16> to vector<8x16x4xbf16>
    %16 = vector.shape_cast %15 : vector<8x16x4xbf16> to vector<128x4xbf16>
    %c1_i32 = arith.constant 1 : i32
    %17 = arith.addi %1, %c1_i32 : i32
    %c0_8 = arith.constant 0 : index
    %18 = arith.index_cast %17 : i32 to index
    %c0_9 = arith.constant 0 : index
    %c0_10 = arith.constant 0 : index
    %19 = vector.load %arg2[%c0_8, %18, %c0_9, %c0_10] : memref<1x18x18x4xbf16, #tpu.memory_space<vmem>>, vector<1x8x16x4xbf16>
    %20 = vector.shape_cast %19 : vector<1x8x16x4xbf16> to vector<8x16x4xbf16>
    %21 = vector.shape_cast %20 : vector<8x16x4xbf16> to vector<128x4xbf16>
    %c1_i32_11 = arith.constant 1 : i32
    %22 = arith.addi %1, %c1_i32_11 : i32
    %c0_12 = arith.constant 0 : index
    %23 = arith.index_cast %22 : i32 to index
    %c1_13 = arith.constant 1 : index
    %c0_14 = arith.constant 0 : index
    %24 = vector.load %arg2[%c0_12, %23, %c1_13, %c0_14] : memref<1x18x18x4xbf16, #tpu.memory_space<vmem>>, vector<1x8x16x4xbf16>
    %25 = vector.shape_cast %24 : vector<1x8x16x4xbf16> to vector<8x16x4xbf16>
    %26 = vector.shape_cast %25 : vector<8x16x4xbf16> to vector<128x4xbf16>
    %c1_i32_15 = arith.constant 1 : i32
    %27 = arith.addi %1, %c1_i32_15 : i32
    %c0_16 = arith.constant 0 : index
    %28 = arith.index_cast %27 : i32 to index
    %c2_17 = arith.constant 2 : index
    %c0_18 = arith.constant 0 : index
    %29 = vector.load %arg2[%c0_16, %28, %c2_17, %c0_18] : memref<1x18x18x4xbf16, #tpu.memory_space<vmem>>, vector<1x8x16x4xbf16>
    %30 = vector.shape_cast %29 : vector<1x8x16x4xbf16> to vector<8x16x4xbf16>
    %31 = vector.shape_cast %30 : vector<8x16x4xbf16> to vector<128x4xbf16>
    %c2_i32 = arith.constant 2 : i32
    %32 = arith.addi %1, %c2_i32 : i32
    %c0_19 = arith.constant 0 : index
    %33 = arith.index_cast %32 : i32 to index
    %c0_20 = arith.constant 0 : index
    %c0_21 = arith.constant 0 : index
    %34 = vector.load %arg2[%c0_19, %33, %c0_20, %c0_21] : memref<1x18x18x4xbf16, #tpu.memory_space<vmem>>, vector<1x8x16x4xbf16>
    %35 = vector.shape_cast %34 : vector<1x8x16x4xbf16> to vector<8x16x4xbf16>
    %36 = vector.shape_cast %35 : vector<8x16x4xbf16> to vector<128x4xbf16>
    %c2_i32_22 = arith.constant 2 : i32
    %37 = arith.addi %1, %c2_i32_22 : i32
    %c0_23 = arith.constant 0 : index
    %38 = arith.index_cast %37 : i32 to index
    %c1_24 = arith.constant 1 : index
    %c0_25 = arith.constant 0 : index
    %39 = vector.load %arg2[%c0_23, %38, %c1_24, %c0_25] : memref<1x18x18x4xbf16, #tpu.memory_space<vmem>>, vector<1x8x16x4xbf16>
    %40 = vector.shape_cast %39 : vector<1x8x16x4xbf16> to vector<8x16x4xbf16>
    %41 = vector.shape_cast %40 : vector<8x16x4xbf16> to vector<128x4xbf16>
    %c2_i32_26 = arith.constant 2 : i32
    %42 = arith.addi %1, %c2_i32_26 : i32
    %c0_27 = arith.constant 0 : index
    %43 = arith.index_cast %42 : i32 to index
    %c2_28 = arith.constant 2 : index
    %c0_29 = arith.constant 0 : index
    %44 = vector.load %arg2[%c0_27, %43, %c2_28, %c0_29] : memref<1x18x18x4xbf16, #tpu.memory_space<vmem>>, vector<1x8x16x4xbf16>
    %45 = vector.shape_cast %44 : vector<1x8x16x4xbf16> to vector<8x16x4xbf16>
    %46 = vector.shape_cast %45 : vector<8x16x4xbf16> to vector<128x4xbf16>
    %47 = tpu.concatenate %6, %11, %16, %21, %26, %31, %36, %41, %46 in 1 : vector<128x4xbf16>, vector<128x4xbf16>, vector<128x4xbf16>, vector<128x4xbf16>, vector<128x4xbf16>, vector<128x4xbf16>, vector<128x4xbf16>, vector<128x4xbf16>, vector<128x4xbf16> -> vector<128x36xbf16>
    %c0_30 = arith.constant 0 : index
    %c0_31 = arith.constant 0 : index
    %48 = vector.load %arg3[%c0_30, %c0_31] : memref<36x128xbf16, #tpu.memory_space<vmem>>, vector<36x128xbf16>
    %cst = arith.constant dense<0.000000e+00> : vector<128x128xf32>
    %49 = tpu.matmul %47, %48, %cst {dimension_numbers = #tpu.dot_dimension_numbers<[1], [0], [0], [1], [0, 0, 1, 1], [], []>} : vector<128x36xbf16>, vector<36x128xbf16>, vector<128x128xf32> -> vector<128x128xf32>
    %c0_32 = arith.constant 0 : index
    %c0_33 = arith.constant 0 : index
    %50 = vector.load %arg4[%c0_32, %c0_33] : memref<128x128xf32, #tpu.memory_space<vmem>>, vector<128x128xf32>
    tpu.vector_store %arg4[%c0_32, %c0_33], %49 {strides = array<i32>} : memref<128x128xf32, #tpu.memory_space<vmem>>, vector<128x128xf32>,
    %cst_34 = arith.constant dense<0.000000e+00> : vector<128xf32>
    %51 = vector.multi_reduction <add>, %49, %cst_34 [0] : vector<128x128xf32> to vector<128xf32>
    %52 = vector.shape_cast %51 : vector<128xf32> to vector<1x128xf32>
    %c0_35 = arith.constant 0 : index
    %c0_36 = arith.constant 0 : index
    %c0_37 = arith.constant 0 : index
    %53 = vector.load %arg5[%c0_35, %c0_36, %c0_37] : memref<1x2x128xf32, #tpu.memory_space<vmem>>, vector<1x1x128xf32>
    %54 = vector.shape_cast %53 : vector<1x1x128xf32> to vector<1x128xf32>
    %55 = vector.shape_cast %52 : vector<1x128xf32> to vector<1x1x128xf32>
    tpu.vector_store %arg5[%c0_35, %c0_36, %c0_37], %55 {strides = array<i32>} : memref<1x2x128xf32, #tpu.memory_space<vmem>>, vector<1x1x128xf32>,
    %56 = arith.mulf %49, %49 : vector<128x128xf32>
    %cst_38 = arith.constant dense<0.000000e+00> : vector<128xf32>
    %57 = vector.multi_reduction <add>, %56, %cst_38 [0] : vector<128x128xf32> to vector<128xf32>
    %58 = vector.shape_cast %57 : vector<128xf32> to vector<1x128xf32>
    %c0_39 = arith.constant 0 : index
    %c1_40 = arith.constant 1 : index
    %c0_41 = arith.constant 0 : index
    %59 = vector.load %arg5[%c0_39, %c1_40, %c0_41] : memref<1x2x128xf32, #tpu.memory_space<vmem>>, vector<1x1x128xf32>
    %60 = vector.shape_cast %59 : vector<1x1x128xf32> to vector<1x128xf32>
    %61 = vector.shape_cast %58 : vector<1x128xf32> to vector<1x1x128xf32>
    tpu.vector_store %arg5[%c0_39, %c1_40, %c0_41], %61 {strides = array<i32>} : memref<1x2x128xf32, #tpu.memory_space<vmem>>, vector<1x1x128xf32>,
    return
  }
  func.func @transform_0(%arg0: i32, %arg1: i32) -> (i32, i32, i32, i32) {
    %c0_i32 = arith.constant 0 : i32
    %c0_i32_0 = arith.constant 0 : i32
    %c0_i32_1 = arith.constant 0 : i32
    %c0_i32_2 = arith.constant 0 : i32
    return %arg0, %c0_i32, %c0_i32_0, %c0_i32_1 : i32, i32, i32, i32
  }
  func.func @transform_1(%arg0: i32, %arg1: i32) -> (i32, i32) {
    %c0_i32 = arith.constant 0 : i32
    %c0_i32_0 = arith.constant 0 : i32
    %c0_i32_1 = arith.constant 0 : i32
    return %c0_i32, %c0_i32_0 : i32, i32
  }
  func.func @transform_2(%arg0: i32, %arg1: i32) -> (i32, i32) {
    %c2_i32 = arith.constant 2 : i32
    %0 = arith.muli %arg0, %c2_i32 : i32
    %1 = arith.addi %0, %arg1 : i32
    %c0_i32 = arith.constant 0 : i32
    %c0_i32_0 = arith.constant 0 : i32
    return %1, %c0_i32 : i32, i32
  }
  func.func @transform_3(%arg0: i32, %arg1: i32) -> (i32, i32, i32) {
    %c2_i32 = arith.constant 2 : i32
    %0 = arith.muli %arg0, %c2_i32 : i32
    %1 = arith.addi %0, %arg1 : i32
    %c0_i32 = arith.constant 0 : i32
    %c0_i32_0 = arith.constant 0 : i32
    %c0_i32_1 = arith.constant 0 : i32
    return %1, %c0_i32, %c0_i32_0 : i32, i32, i32
  }
}

module attributes {stable_mosaic.version = 11 : i64} {
  func.func @bn_relu_kernel(%arg0: i32, %arg1: memref<512x128xf32, #tpu.memory_space<vmem>>, %arg2: memref<1x128xf32, #tpu.memory_space<vmem>>, %arg3: memref<1x128xf32, #tpu.memory_space<vmem>>, %arg4: memref<512x128xf32, #tpu.memory_space<vmem>>) attributes {dimension_semantics = [#tpu.dimension_semantics<parallel>], iteration_bounds = array<i64: 1>, scalar_prefetch = 0 : i64, scratch_operands = 0 : i64, tpu.core_type = #tpu.core_type<tc>, window_params = [{transform_indices = @transform_0, window_bounds = array<i64: 512, 128>}, {pipeline_mode = #tpu.pipeline_mode<synchronous>, transform_indices = @transform_1, window_bounds = array<i64: 1, 128>}, {pipeline_mode = #tpu.pipeline_mode<synchronous>, transform_indices = @transform_2, window_bounds = array<i64: 1, 128>}, {transform_indices = @transform_3, window_bounds = array<i64: 512, 128>}]} {
    %c0 = arith.constant 0 : index
    %c0_0 = arith.constant 0 : index
    %0 = vector.load %arg1[%c0, %c0_0] : memref<512x128xf32, #tpu.memory_space<vmem>>, vector<512x128xf32>
    %c0_1 = arith.constant 0 : index
    %c0_2 = arith.constant 0 : index
    %1 = vector.load %arg2[%c0_1, %c0_2] : memref<1x128xf32, #tpu.memory_space<vmem>>, vector<1x128xf32>
    %2 = vector.broadcast %1 : vector<1x128xf32> to vector<512x128xf32>
    %3 = arith.mulf %0, %2 : vector<512x128xf32>
    %c0_3 = arith.constant 0 : index
    %c0_4 = arith.constant 0 : index
    %4 = vector.load %arg3[%c0_3, %c0_4] : memref<1x128xf32, #tpu.memory_space<vmem>>, vector<1x128xf32>
    %5 = vector.broadcast %4 : vector<1x128xf32> to vector<512x128xf32>
    %6 = arith.addf %3, %5 : vector<512x128xf32>
    %cst = arith.constant 0.000000e+00 : f32
    %7 = vector.broadcast %cst : f32 to vector<512x128xf32>
    %8 = arith.maximumf %6, %7 : vector<512x128xf32>
    %c0_5 = arith.constant 0 : index
    %c0_6 = arith.constant 0 : index
    %9 = vector.load %arg4[%c0_5, %c0_6] : memref<512x128xf32, #tpu.memory_space<vmem>>, vector<512x128xf32>
    tpu.vector_store %arg4[%c0_5, %c0_6], %8 {strides = array<i32>} : memref<512x128xf32, #tpu.memory_space<vmem>>, vector<512x128xf32>,
    return
  }
  func.func @transform_0(%arg0: i32) -> (i32, i32) {
    %c0_i32 = arith.constant 0 : i32
    %c0_i32_0 = arith.constant 0 : i32
    return %arg0, %c0_i32 : i32, i32
  }
  func.func @transform_1(%arg0: i32) -> (i32, i32) {
    %c0_i32 = arith.constant 0 : i32
    %c0_i32_0 = arith.constant 0 : i32
    %c0_i32_1 = arith.constant 0 : i32
    return %c0_i32, %c0_i32_0 : i32, i32
  }
  func.func @transform_2(%arg0: i32) -> (i32, i32) {
    %c0_i32 = arith.constant 0 : i32
    %c0_i32_0 = arith.constant 0 : i32
    %c0_i32_1 = arith.constant 0 : i32
    return %c0_i32, %c0_i32_0 : i32, i32
  }
  func.func @transform_3(%arg0: i32) -> (i32, i32) {
    %c0_i32 = arith.constant 0 : i32
    %c0_i32_0 = arith.constant 0 : i32
    return %arg0, %c0_i32 : i32, i32
  }
}

</mosaic_0001>

<bundles_post_ra>
// kernel: conv_bn_relu.3
= control target key start
LH: loop header
LB: loop body
LE: loop exit
PB: predicated region body
PF: predicated region fallthrough
CT: control target
= control target key end

     0   :  { %s896_s0 = inlined_call_operand.vmem [shape: f32[512,128], index: 0, kind: input, shape index: {}, may-alias: {0,3}]   ;;  %s897_s1 = inlined_call_operand.vmem [shape: f32[1,128], index: 1, kind: input, shape index: {}]   ;;  %s898_s2 = inlined_call_operand.vmem [shape: f32[1,128], index: 2, kind: input, shape index: {}]   ;;  %s899_s3 = inlined_call_operand.vmem [shape: f32[512,128], index: 3, kind: output, shape index: {}, may-alias: {0,3}]  }
   0x1   :  { %v14_v0 = vld [vmem:[%s896_s0] sm:$0xff]  ;;  %v15_v4 = vld [vmem:[%s896_s0 + $0x8] sm:$0xff]  ;;  %v16_v5 = vld [vmem:[%s896_s0 + $0x10] sm:$0xff] }
   0x2   :  { %v380_v1 = vld [vmem:[%s897_s1] ss:$0 sm:$0xff]  ;;  %v17_v6 = vld [vmem:[%s896_s0 + $0x18] sm:$0xff]  ;;  %v19_v11 = vld [vmem:[%s896_s0 + $0x28] sm:$0xff] }
   0x3   :  { %v385_v2 = vld [vmem:[%s898_s2] ss:$0 sm:$0xff]  ;;  %v85_v3 = vmul.f32 %v380_v1, %v14_v0  ;;  %v86_v7 = vmul.f32 %v380_v1, %v15_v4  ;;  %v87_v8 = vmul.f32 %v380_v1, %v16_v5  ;;  %v88_v9 = vmul.f32 %v380_v1, %v17_v6  ;;  %v20_v12 = vld [vmem:[%s896_s0 + $0x30] sm:$0xff]  ;;  %v21_v17 = vld [vmem:[%s896_s0 + $0x38] sm:$0xff] }
   0x4   :  { %v18_v10 = vld [vmem:[%s896_s0 + $0x20] sm:$0xff]  ;;  %v90_v15 = vmul.f32 %v380_v1, %v19_v11  ;;  %v91_v16 = vmul.f32 %v380_v1, %v20_v12  ;;  %v92_v21 = vmul.f32 %v380_v1, %v21_v17  ;;  %v23_v27 = vld [vmem:[%s896_s0 + $0x48] sm:$0xff]  ;;  %v24_v28 = vld [vmem:[%s896_s0 + $0x50] sm:$0xff] }
   0x5   :  { %v156_v13 = vadd.f32 %v385_v2, %v85_v3  ;;  %v89_v14 = vmul.f32 %v380_v1, %v18_v10  ;;  %v157_v18 = vadd.f32 %v385_v2, %v86_v7  ;;  %v158_v19 = vadd.f32 %v385_v2, %v87_v8  ;;  %v22_v22 = vld [vmem:[%s896_s0 + $0x40] sm:$0xff]  ;;  %v25_v29 = vld [vmem:[%s896_s0 + $0x58] sm:$0xff]  ;;  %v27_v35 = vld [vmem:[%s896_s0 + $0x68] sm:$0xff] }
   0x6   :  { %v159_v20 = vadd.f32 %v385_v2, %v88_v9  ;;  %v161_v25 = vadd.f32 %v385_v2, %v90_v15  ;;  %v162_v26 = vadd.f32 %v385_v2, %v91_v16  ;;  %v163_v33 = vadd.f32 %v385_v2, %v92_v21  ;;  %v26_v34 = vld [vmem:[%s896_s0 + $0x60] sm:$0xff]  ;;  %v28_v36 = vld [vmem:[%s896_s0 + $0x70] sm:$0xff] }
   0x7   :  { %v220_v23 = vmax.f32 %v156_v13, 0.0  ;;  %v160_v24 = vadd.f32 %v385_v2, %v89_v14  ;;  %v221_v30 = vmax.f32 %v157_v18, 0.0  ;;  %v222_v31 = vmax.f32 %v158_v19, 0.0 }
   0x8   :  { %v223_v32 = vmax.f32 %v159_v20, 0.0  ;;  %v225_v38 = vmax.f32 %v161_v25, 0.0  ;;  %v226_v39 = vmax.f32 %v162_v26, 0.0  ;;  %v93_v40 = vmul.f32 %v380_v1, %v22_v22 }
   0x9   :  { %284 = vst [vmem:[%s899_s3] sm:$0xff] %v220_v23  ;;  %v224_v37 = vmax.f32 %v160_v24, 0.0  ;;  %v227_v42 = vmax.f32 %v163_v33, 0.0  ;;  %v94_v43 = vmul.f32 %v380_v1, %v23_v27  ;;  %v95_v44 = vmul.f32 %v380_v1, %v24_v28 }
   0xa   :  { %v96_v45 = vmul.f32 %v380_v1, %v25_v29  ;;  %v164_v46 = vadd.f32 %v385_v2, %v93_v40  ;;  %v97_v47 = vmul.f32 %v380_v1, %v26_v34  ;;  %v98_v48 = vmul.f32 %v380_v1, %v27_v35 }
   0xb   :  { %v99_v49 = vmul.f32 %v380_v1, %v28_v36  ;;  %v165_v50 = vadd.f32 %v385_v2, %v94_v43  ;;  %v166_v51 = vadd.f32 %v385_v2, %v95_v44 }
   0xc   :  { %v167_v52 = vadd.f32 %v385_v2, %v96_v45  ;;  %v228_v55 = vmax.f32 %v164_v46, 0.0  ;;  %v168_v56 = vadd.f32 %v385_v2, %v97_v47  ;;  %v169_v57 = vadd.f32 %v385_v2, %v98_v48 }
   0xd   :  { %v170_v58 = vadd.f32 %v385_v2, %v99_v49  ;;  %v229_v62 = vmax.f32 %v165_v50, 0.0  ;;  %v230_v63 = vmax.f32 %v166_v51, 0.0 }
   0xe   :  { %v231_v0 = vmax.f32 %v167_v52, 0.0  ;;  %v232_v7 = vmax.f32 %v168_v56, 0.0  ;;  %v233_v8 = vmax.f32 %v169_v57, 0.0 }
   0xf   :  { %v234_v9 = vmax.f32 %v170_v58, 0.0 }
  0x10   :  { %v29_v41 = vld [vmem:[%s896_s0 + $0x78] sm:$0xff] }
  0x11   :  { %285 = vst [vmem:[%s899_s3 + $0x8] sm:$0xff] %v221_v30  ;;  %286 = vst [vmem:[%s899_s3 + $0x10] sm:$0xff] %v222_v31  ;;  %v100_v53 = vmul.f32 %v380_v1, %v29_v41 }
  0x12   :  { %287 = vst [vmem:[%s899_s3 + $0x18] sm:$0xff] %v223_v32  ;;  %288 = vst [vmem:[%s899_s3 + $0x20] sm:$0xff] %v224_v37 }
  0x13   :  { %289 = vst [vmem:[%s899_s3 + $0x28] sm:$0xff] %v225_v38  ;;  %290 = vst [vmem:[%s899_s3 + $0x30] sm:$0xff] %v226_v39  ;;  %v171_v3 = vadd.f32 %v385_v2, %v100_v53 }
  0x14   :  { %291 = vst [vmem:[%s899_s3 + $0x38] sm:$0xff] %v227_v42 }
  0x15   :  { %v235_v12 = vmax.f32 %v171_v3, 0.0 }
  0x1b   :  { %v30_v54 = vld [vmem:[%s896_s0 + $0x80] sm:$0xff]  ;;  %v31_v59 = vld [vmem:[%s896_s0 + $0x88] sm:$0xff]  ;;  %v32_v60 = vld [vmem:[%s896_s0 + $0x90] sm:$0xff] }
  0x1c   :  { %v33_v61 = vld [vmem:[%s896_s0 + $0x98] sm:$0xff]  ;;  %v34_v4 = vld [vmem:[%s896_s0 + $0xa0] sm:$0xff]  ;;  %v35_v5 = vld [vmem:[%s896_s0 + $0xa8] sm:$0xff]  ;;  %v101_v10 = vmul.f32 %v380_v1, %v30_v54  ;;  %v102_v13 = vmul.f32 %v380_v1, %v31_v59  ;;  %v103_v14 = vmul.f32 %v380_v1, %v32_v60 }
  0x1d   :  { %v36_v6 = vld [vmem:[%s896_s0 + $0xb0] sm:$0xff]  ;;  %v104_v15 = vmul.f32 %v380_v1, %v33_v61  ;;  %v105_v17 = vmul.f32 %v380_v1, %v34_v4  ;;  %v106_v18 = vmul.f32 %v380_v1, %v35_v5 }
  0x1e   :  { %292 = vst [vmem:[%s899_s3 + $0x40] sm:$0xff] %v228_v55  ;;  %v172_v16 = vadd.f32 %v385_v2, %v101_v10  ;;  %v107_v19 = vmul.f32 %v380_v1, %v36_v6  ;;  %v173_v20 = vadd.f32 %v385_v2, %v102_v13  ;;  %v174_v21 = vadd.f32 %v385_v2, %v103_v14 }
  0x1f   :  { %v175_v22 = vadd.f32 %v385_v2, %v104_v15  ;;  %v176_v26 = vadd.f32 %v385_v2, %v105_v17  ;;  %v177_v27 = vadd.f32 %v385_v2, %v106_v18 }
  0x20   :  { %v236_v25 = vmax.f32 %v172_v16, 0.0  ;;  %v178_v28 = vadd.f32 %v385_v2, %v107_v19  ;;  %v237_v32 = vmax.f32 %v173_v20, 0.0  ;;  %v238_v33 = vmax.f32 %v174_v21, 0.0 }
  0x21   :  { %v239_v34 = vmax.f32 %v175_v22, 0.0  ;;  %v240_v39 = vmax.f32 %v176_v26, 0.0  ;;  %v241_v40 = vmax.f32 %v177_v27, 0.0 }
  0x22   :  { %v242_v41 = vmax.f32 %v178_v28, 0.0 }
  0x25   :  { %v37_v11 = vld [vmem:[%s896_s0 + $0xb8] sm:$0xff] }
  0x26   :  { %293 = vst [vmem:[%s899_s3 + $0x48] sm:$0xff] %v229_v62  ;;  %294 = vst [vmem:[%s899_s3 + $0x50] sm:$0xff] %v230_v63  ;;  %v108_v23 = vmul.f32 %v380_v1, %v37_v11 }
  0x27   :  { %295 = vst [vmem:[%s899_s3 + $0x58] sm:$0xff] %v231_v0  ;;  %296 = vst [vmem:[%s899_s3 + $0x60] sm:$0xff] %v232_v7 }
  0x28   :  { %297 = vst [vmem:[%s899_s3 + $0x68] sm:$0xff] %v233_v8  ;;  %298 = vst [vmem:[%s899_s3 + $0x70] sm:$0xff] %v234_v9  ;;  %v179_v35 = vadd.f32 %v385_v2, %v108_v23 }
  0x29   :  { %299 = vst [vmem:[%s899_s3 + $0x78] sm:$0xff] %v235_v12 }
  0x2a   :  { %v243_v44 = vmax.f32 %v179_v35, 0.0 }
  0x30   :  { %v38_v24 = vld [vmem:[%s896_s0 + $0xc0] sm:$0xff]  ;;  %v39_v29 = vld [vmem:[%s896_s0 + $0xc8] sm:$0xff]  ;;  %v40_v30 = vld [vmem:[%s896_s0 + $0xd0] sm:$0xff] }
  0x31   :  { %v41_v31 = vld [vmem:[%s896_s0 + $0xd8] sm:$0xff]  ;;  %v42_v36 = vld [vmem:[%s896_s0 + $0xe0] sm:$0xff]  ;;  %v43_v37 = vld [vmem:[%s896_s0 + $0xe8] sm:$0xff]  ;;  %v109_v42 = vmul.f32 %v380_v1, %v38_v24  ;;  %v110_v45 = vmul.f32 %v380_v1, %v39_v29  ;;  %v111_v46 = vmul.f32 %v380_v1, %v40_v30 }
  0x32   :  { %v44_v38 = vld [vmem:[%s896_s0 + $0xf0] sm:$0xff]  ;;  %v112_v47 = vmul.f32 %v380_v1, %v41_v31  ;;  %v113_v49 = vmul.f32 %v380_v1, %v42_v36  ;;  %v114_v50 = vmul.f32 %v380_v1, %v43_v37 }
  0x33   :  { %300 = vst [vmem:[%s899_s3 + $0x80] sm:$0xff] %v236_v25  ;;  %v180_v48 = vadd.f32 %v385_v2, %v109_v42  ;;  %v115_v51 = vmul.f32 %v380_v1, %v44_v38  ;;  %v181_v52 = vadd.f32 %v385_v2, %v110_v45  ;;  %v182_v53 = vadd.f32 %v385_v2, %v111_v46 }
  0x34   :  { %v183_v54 = vadd.f32 %v385_v2, %v112_v47  ;;  %v184_v58 = vadd.f32 %v385_v2, %v113_v49  ;;  %v185_v59 = vadd.f32 %v385_v2, %v114_v50 }
  0x35   :  { %v244_v57 = vmax.f32 %v180_v48, 0.0  ;;  %v186_v60 = vadd.f32 %v385_v2, %v115_v51  ;;  %v245_v0 = vmax.f32 %v181_v52, 0.0  ;;  %v246_v3 = vmax.f32 %v182_v53, 0.0 }
  0x36   :  { %v247_v4 = vmax.f32 %v183_v54, 0.0  ;;  %v248_v9 = vmax.f32 %v184_v58, 0.0  ;;  %v249_v10 = vmax.f32 %v185_v59, 0.0 }
  0x37   :  { %v250_v11 = vmax.f32 %v186_v60, 0.0 }
  0x3a   :  { %v45_v43 = vld [vmem:[%s896_s0 + $0xf8] sm:$0xff] }
  0x3b   :  { %301 = vst [vmem:[%s899_s3 + $0x88] sm:$0xff] %v237_v32  ;;  %302 = vst [vmem:[%s899_s3 + $0x90] sm:$0xff] %v238_v33  ;;  %v116_v55 = vmul.f32 %v380_v1, %v45_v43 }
  0x3c   :  { %303 = vst [vmem:[%s899_s3 + $0x98] sm:$0xff] %v239_v34  ;;  %304 = vst [vmem:[%s899_s3 + $0xa0] sm:$0xff] %v240_v39 }
  0x3d   :  { %305 = vst [vmem:[%s899_s3 + $0xa8] sm:$0xff] %v241_v40  ;;  %306 = vst [vmem:[%s899_s3 + $0xb0] sm:$0xff] %v242_v41  ;;  %v187_v5 = vadd.f32 %v385_v2, %v116_v55 }
  0x3e   :  { %307 = vst [vmem:[%s899_s3 + $0xb8] sm:$0xff] %v243_v44 }
  0x3f   :  { %v251_v14 = vmax.f32 %v187_v5, 0.0 }
  0x45   :  { %v46_v56 = vld [vmem:[%s896_s0 + $0x100] sm:$0xff]  ;;  %v47_v61 = vld [vmem:[%s896_s0 + $0x108] sm:$0xff]  ;;  %v48_v62 = vld [vmem:[%s896_s0 + $0x110] sm:$0xff] }
  0x46   :  { %v49_v63 = vld [vmem:[%s896_s0 + $0x118] sm:$0xff]  ;;  %v50_v6 = vld [vmem:[%s896_s0 + $0x120] sm:$0xff]  ;;  %v51_v7 = vld [vmem:[%s896_s0 + $0x128] sm:$0xff]  ;;  %v117_v12 = vmul.f32 %v380_v1, %v46_v56  ;;  %v118_v15 = vmul.f32 %v380_v1, %v47_v61  ;;  %v119_v16 = vmul.f32 %v380_v1, %v48_v62 }
  0x47   :  { %v52_v8 = vld [vmem:[%s896_s0 + $0x130] sm:$0xff]  ;;  %v120_v17 = vmul.f32 %v380_v1, %v49_v63  ;;  %v121_v19 = vmul.f32 %v380_v1, %v50_v6  ;;  %v122_v20 = vmul.f32 %v380_v1, %v51_v7 }
  0x48   :  { %308 = vst [vmem:[%s899_s3 + $0xc0] sm:$0xff] %v244_v57  ;;  %v188_v18 = vadd.f32 %v385_v2, %v117_v12  ;;  %v123_v21 = vmul.f32 %v380_v1, %v52_v8  ;;  %v189_v22 = vadd.f32 %v385_v2, %v118_v15  ;;  %v190_v23 = vadd.f32 %v385_v2, %v119_v16 }
  0x49   :  { %v191_v24 = vadd.f32 %v385_v2, %v120_v17  ;;  %v192_v28 = vadd.f32 %v385_v2, %v121_v19  ;;  %v193_v29 = vadd.f32 %v385_v2, %v122_v20 }
  0x4a   :  { %v252_v27 = vmax.f32 %v188_v18, 0.0  ;;  %v194_v30 = vadd.f32 %v385_v2, %v123_v21  ;;  %v253_v34 = vmax.f32 %v189_v22, 0.0  ;;  %v254_v35 = vmax.f32 %v190_v23, 0.0 }
  0x4b   :  { %v255_v36 = vmax.f32 %v191_v24, 0.0  ;;  %v256_v41 = vmax.f32 %v192_v28, 0.0  ;;  %v257_v42 = vmax.f32 %v193_v29, 0.0 }
  0x4c   :  { %v258_v43 = vmax.f32 %v194_v30, 0.0 }
  0x4f   :  { %v53_v13 = vld [vmem:[%s896_s0 + $0x138] sm:$0xff] }
  0x50   :  { %309 = vst [vmem:[%s899_s3 + $0xc8] sm:$0xff] %v245_v0  ;;  %310 = vst [vmem:[%s899_s3 + $0xd0] sm:$0xff] %v246_v3  ;;  %v124_v25 = vmul.f32 %v380_v1, %v53_v13 }
  0x51   :  { %311 = vst [vmem:[%s899_s3 + $0xd8] sm:$0xff] %v247_v4  ;;  %312 = vst [vmem:[%s899_s3 + $0xe0] sm:$0xff] %v248_v9 }
  0x52   :  { %313 = vst [vmem:[%s899_s3 + $0xe8] sm:$0xff] %v249_v10  ;;  %314 = vst [vmem:[%s899_s3 + $0xf0] sm:$0xff] %v250_v11  ;;  %v195_v37 = vadd.f32 %v385_v2, %v124_v25 }
  0x53   :  { %315 = vst [vmem:[%s899_s3 + $0xf8] sm:$0xff] %v251_v14 }
  0x54   :  { %v259_v46 = vmax.f32 %v195_v37, 0.0 }
  0x5a   :  { %v54_v26 = vld [vmem:[%s896_s0 + $0x140] sm:$0xff]  ;;  %v55_v31 = vld [vmem:[%s896_s0 + $0x148] sm:$0xff]  ;;  %v56_v32 = vld [vmem:[%s896_s0 + $0x150] sm:$0xff] }
  0x5b   :  { %v57_v33 = vld [vmem:[%s896_s0 + $0x158] sm:$0xff]  ;;  %v58_v38 = vld [vmem:[%s896_s0 + $0x160] sm:$0xff]  ;;  %v59_v39 = vld [vmem:[%s896_s0 + $0x168] sm:$0xff]  ;;  %v125_v44 = vmul.f32 %v380_v1, %v54_v26  ;;  %v126_v47 = vmul.f32 %v380_v1, %v55_v31  ;;  %v127_v48 = vmul.f32 %v380_v1, %v56_v32 }
  0x5c   :  { %v60_v40 = vld [vmem:[%s896_s0 + $0x170] sm:$0xff]  ;;  %v128_v49 = vmul.f32 %v380_v1, %v57_v33  ;;  %v129_v51 = vmul.f32 %v380_v1, %v58_v38  ;;  %v130_v52 = vmul.f32 %v380_v1, %v59_v39 }
  0x5d   :  { %316 = vst [vmem:[%s899_s3 + $0x100] sm:$0xff] %v252_v27  ;;  %v196_v50 = vadd.f32 %v385_v2, %v125_v44  ;;  %v131_v53 = vmul.f32 %v380_v1, %v60_v40  ;;  %v197_v54 = vadd.f32 %v385_v2, %v126_v47  ;;  %v198_v55 = vadd.f32 %v385_v2, %v127_v48 }
  0x5e   :  { %v199_v56 = vadd.f32 %v385_v2, %v128_v49  ;;  %v200_v60 = vadd.f32 %v385_v2, %v129_v51  ;;  %v201_v61 = vadd.f32 %v385_v2, %v130_v52 }
  0x5f   :  { %v260_v59 = vmax.f32 %v196_v50, 0.0  ;;  %v202_v62 = vadd.f32 %v385_v2, %v131_v53  ;;  %v261_v4 = vmax.f32 %v197_v54, 0.0  ;;  %v262_v5 = vmax.f32 %v198_v55, 0.0 }
  0x60   :  { %v263_v6 = vmax.f32 %v199_v56, 0.0  ;;  %v264_v11 = vmax.f32 %v200_v60, 0.0  ;;  %v265_v12 = vmax.f32 %v201_v61, 0.0 }
  0x61   :  { %v266_v13 = vmax.f32 %v202_v62, 0.0 }
  0x64   :  { %v61_v45 = vld [vmem:[%s896_s0 + $0x178] sm:$0xff] }
  0x65   :  { %317 = vst [vmem:[%s899_s3 + $0x108] sm:$0xff] %v253_v34  ;;  %318 = vst [vmem:[%s899_s3 + $0x110] sm:$0xff] %v254_v35  ;;  %v132_v57 = vmul.f32 %v380_v1, %v61_v45 }
  0x66   :  { %319 = vst [vmem:[%s899_s3 + $0x118] sm:$0xff] %v255_v36  ;;  %320 = vst [vmem:[%s899_s3 + $0x120] sm:$0xff] %v256_v41 }
  0x67   :  { %321 = vst [vmem:[%s899_s3 + $0x128] sm:$0xff] %v257_v42  ;;  %322 = vst [vmem:[%s899_s3 + $0x130] sm:$0xff] %v258_v43  ;;  %v203_v7 = vadd.f32 %v385_v2, %v132_v57 }
  0x68   :  { %323 = vst [vmem:[%s899_s3 + $0x138] sm:$0xff] %v259_v46 }
  0x69   :  { %v267_v16 = vmax.f32 %v203_v7, 0.0 }
  0x6f   :  { %v62_v58 = vld [vmem:[%s896_s0 + $0x180] sm:$0xff]  ;;  %v63_v63 = vld [vmem:[%s896_s0 + $0x188] sm:$0xff]  ;;  %v64_v0 = vld [vmem:[%s896_s0 + $0x190] sm:$0xff] }
  0x70   :  { %v65_v3 = vld [vmem:[%s896_s0 + $0x198] sm:$0xff]  ;;  %v66_v8 = vld [vmem:[%s896_s0 + $0x1a0] sm:$0xff]  ;;  %v67_v9 = vld [vmem:[%s896_s0 + $0x1a8] sm:$0xff]  ;;  %v133_v14 = vmul.f32 %v380_v1, %v62_v58  ;;  %v134_v17 = vmul.f32 %v380_v1, %v63_v63  ;;  %v135_v18 = vmul.f32 %v380_v1, %v64_v0 }
  0x71   :  { %v68_v10 = vld [vmem:[%s896_s0 + $0x1b0] sm:$0xff]  ;;  %v136_v19 = vmul.f32 %v380_v1, %v65_v3  ;;  %v137_v21 = vmul.f32 %v380_v1, %v66_v8  ;;  %v138_v22 = vmul.f32 %v380_v1, %v67_v9 }
  0x72   :  { %324 = vst [vmem:[%s899_s3 + $0x140] sm:$0xff] %v260_v59  ;;  %v204_v20 = vadd.f32 %v385_v2, %v133_v14  ;;  %v139_v23 = vmul.f32 %v380_v1, %v68_v10  ;;  %v205_v24 = vadd.f32 %v385_v2, %v134_v17  ;;  %v206_v25 = vadd.f32 %v385_v2, %v135_v18 }
  0x73   :  { %v207_v26 = vadd.f32 %v385_v2, %v136_v19  ;;  %v208_v30 = vadd.f32 %v385_v2, %v137_v21  ;;  %v209_v31 = vadd.f32 %v385_v2, %v138_v22 }
  0x74   :  { %v268_v29 = vmax.f32 %v204_v20, 0.0  ;;  %v210_v32 = vadd.f32 %v385_v2, %v139_v23  ;;  %v269_v36 = vmax.f32 %v205_v24, 0.0  ;;  %v270_v37 = vmax.f32 %v206_v25, 0.0 }
  0x75   :  { %v271_v38 = vmax.f32 %v207_v26, 0.0  ;;  %v272_v43 = vmax.f32 %v208_v30, 0.0  ;;  %v273_v44 = vmax.f32 %v209_v31, 0.0 }
  0x76   :  { %v274_v45 = vmax.f32 %v210_v32, 0.0 }
  0x79   :  { %v69_v15 = vld [vmem:[%s896_s0 + $0x1b8] sm:$0xff] }
  0x7a   :  { %325 = vst [vmem:[%s899_s3 + $0x148] sm:$0xff] %v261_v4  ;;  %326 = vst [vmem:[%s899_s3 + $0x150] sm:$0xff] %v262_v5  ;;  %v140_v27 = vmul.f32 %v380_v1, %v69_v15 }
  0x7b   :  { %327 = vst [vmem:[%s899_s3 + $0x158] sm:$0xff] %v263_v6  ;;  %328 = vst [vmem:[%s899_s3 + $0x160] sm:$0xff] %v264_v11 }
  0x7c   :  { %329 = vst [vmem:[%s899_s3 + $0x168] sm:$0xff] %v265_v12  ;;  %330 = vst [vmem:[%s899_s3 + $0x170] sm:$0xff] %v266_v13  ;;  %v211_v39 = vadd.f32 %v385_v2, %v140_v27 }
  0x7d   :  { %331 = vst [vmem:[%s899_s3 + $0x178] sm:$0xff] %v267_v16 }
  0x7e   :  { %v275_v48 = vmax.f32 %v211_v39, 0.0 }
  0x84   :  { %v70_v28 = vld [vmem:[%s896_s0 + $0x1c0] sm:$0xff]  ;;  %v71_v33 = vld [vmem:[%s896_s0 + $0x1c8] sm:$0xff]  ;;  %v72_v34 = vld [vmem:[%s896_s0 + $0x1d0] sm:$0xff] }
  0x85   :  { %v73_v35 = vld [vmem:[%s896_s0 + $0x1d8] sm:$0xff]  ;;  %v74_v40 = vld [vmem:[%s896_s0 + $0x1e0] sm:$0xff]  ;;  %v75_v41 = vld [vmem:[%s896_s0 + $0x1e8] sm:$0xff]  ;;  %v141_v46 = vmul.f32 %v380_v1, %v70_v28  ;;  %v142_v49 = vmul.f32 %v380_v1, %v71_v33  ;;  %v143_v50 = vmul.f32 %v380_v1, %v72_v34 }
  0x86   :  { %v76_v42 = vld [vmem:[%s896_s0 + $0x1f0] sm:$0xff]  ;;  %v144_v51 = vmul.f32 %v380_v1, %v73_v35  ;;  %v145_v53 = vmul.f32 %v380_v1, %v74_v40  ;;  %v146_v54 = vmul.f32 %v380_v1, %v75_v41 }
  0x87   :  { %332 = vst [vmem:[%s899_s3 + $0x180] sm:$0xff] %v268_v29  ;;  %v212_v52 = vadd.f32 %v385_v2, %v141_v46  ;;  %v147_v55 = vmul.f32 %v380_v1, %v76_v42  ;;  %v213_v56 = vadd.f32 %v385_v2, %v142_v49  ;;  %v214_v57 = vadd.f32 %v385_v2, %v143_v50 }
  0x88   :  { %v215_v58 = vadd.f32 %v385_v2, %v144_v51  ;;  %v216_v61 = vadd.f32 %v385_v2, %v145_v53  ;;  %v217_v62 = vadd.f32 %v385_v2, %v146_v54 }
  0x89   :  { %v276_v60 = vmax.f32 %v212_v52, 0.0  ;;  %v218_v63 = vadd.f32 %v385_v2, %v147_v55  ;;  %v277_v0 = vmax.f32 %v213_v56, 0.0  ;;  %v278_v3 = vmax.f32 %v214_v57, 0.0 }
  0x8a   :  { %v279_v4 = vmax.f32 %v215_v58, 0.0  ;;  %v280_v6 = vmax.f32 %v216_v61, 0.0  ;;  %v281_v7 = vmax.f32 %v217_v62, 0.0 }
  0x8b   :  { %v282_v8 = vmax.f32 %v218_v63, 0.0 }
  0x8e   :  { %v77_v47 = vld [vmem:[%s896_s0 + $0x1f8] sm:$0xff] }
  0x8f   :  { %333 = vst [vmem:[%s899_s3 + $0x188] sm:$0xff] %v269_v36  ;;  %334 = vst [vmem:[%s899_s3 + $0x190] sm:$0xff] %v270_v37  ;;  %v148_v59 = vmul.f32 %v380_v1, %v77_v47 }
  0x90   :  { %335 = vst [vmem:[%s899_s3 + $0x198] sm:$0xff] %v271_v38  ;;  %336 = vst [vmem:[%s899_s3 + $0x1a0] sm:$0xff] %v272_v43 }
  0x91   :  { %337 = vst [vmem:[%s899_s3 + $0x1a8] sm:$0xff] %v273_v44  ;;  %338 = vst [vmem:[%s899_s3 + $0x1b0] sm:$0xff] %v274_v45  ;;  %v219_v5 = vadd.f32 %v385_v2, %v148_v59 }
  0x92   :  { %339 = vst [vmem:[%s899_s3 + $0x1b8] sm:$0xff] %v275_v48  ;;  %340 = vst [vmem:[%s899_s3 + $0x1c0] sm:$0xff] %v276_v60 }
  0x93   :  { %341 = vst [vmem:[%s899_s3 + $0x1c8] sm:$0xff] %v277_v0  ;;  %342 = vst [vmem:[%s899_s3 + $0x1d0] sm:$0xff] %v278_v3  ;;  %v283_v1 = vmax.f32 %v219_v5, 0.0 }
  0x94   :  { %343 = vst [vmem:[%s899_s3 + $0x1d8] sm:$0xff] %v279_v4  ;;  %344 = vst [vmem:[%s899_s3 + $0x1e0] sm:$0xff] %v280_v6 }
  0x95   :  { %345 = vst [vmem:[%s899_s3 + $0x1e8] sm:$0xff] %v281_v7  ;;  %346 = vst [vmem:[%s899_s3 + $0x1f0] sm:$0xff] %v282_v8 }
  0x96   :  { %347 = vst [vmem:[%s899_s3 + $0x1f8] sm:$0xff] %v283_v1 }

// kernel: conv_bn_relu.2
= control target key start
LH: loop header
LB: loop body
LE: loop exit
PB: predicated region body
PF: predicated region fallthrough
CT: control target
= control target key end

     0   :  { %s2384_s12 = smov 0   ;;  %s2386_s13 = smov 0   ;;  %s3192_s0 = inlined_call_operand.vmem [shape: bf16[2,18,18,4], index: 0, kind: input, shape index: {}]   ;;  %s3193_s1 = inlined_call_operand.vmem [shape: bf16[36,128], index: 1, kind: input, shape index: {}]   ;;  %s3194_s2 = inlined_call_operand.vmem [shape: f32[512,128], index: 2, kind: output, shape index: {0}]   ;;  %s3195_s3 = inlined_call_operand.vmem [shape: f32[4,2,128], index: 3, kind: output, shape index: {1}]  }
   0x1   :  { %s2388_s14 = smov 0   ;;  %s2390_s15 = smov 0  }
   0x2   :  { %s2392_s16 = smov 0  }
   0x3 LB: > { %s23_s17 = sadd.s32 1, %s2346_s14  ;;  %s26_s18 = sadd.s32 1, %s2350_s15  ;;  %s2354_s16 = sphi %s2392_s16, %s14_s16   ;;  %s2350_s15 = sphi %s2390_s15, %s3203_s15   ;;  %s2346_s14 = sphi %s2388_s14, %s3202_s14   ;;  %s2342_s13 = sphi %s2386_s13, %s3201_s13   ;;  %s2338_s12 = sphi %s2384_s12, %s3200_s12  }
   0x4   : > { %p24_p0 = scmp.ge.s32.totalorder %s23_s17, 2  ;;  %p2001_p1 = scmp.ge.s32.totalorder %s2354_s16, 1 }
   0x5   : > { %p160_p2 = scmp.lt.s32.totalorder %s2354_s16, 5 }
   0x6   : > { %s3205_s17 = smov (%p24_p0, %s23_s17), 0  ;;  %s3207_s18 = smov (!%p24_p0, %s26_s18), %s2350_s15 }
   0x7   : > { %p161_p3 = pnand %p2001_p1, %p160_p2  ;;  %p28_p4 = scmp.ge.s32.totalorder %s3207_s18, 2 }
   0x8   : > { %p192_p5 = scmp.lt.s32.totalorder (!%p161_p3), %s2342_s13, 1  ;;  %s2188_s20 = smul.u32 (!%p161_p3), 96, %s2338_s12  ;;  %vm471_vm0 = vcmask (!%p161_p3), 1042432   ;;  %vm472_vm1 = vcmask (!%p161_p3), 1046532   ;;  %vm244_vm3 = vsmask.f32 (!%p161_p3), 3328 }
   0x9   : > { %s3209_s18 = smov (%p28_p4, %s3207_s18), 0  ;;  %164 = sbr.rel (%p161_p3) target bundleno = 530 (0x212), region = 28 }
   0xa   : > { %s2356_s26 = smov (!%p161_p3), 12   ;;  %s2357_s27 = smov (!%p161_p3), 24   ;;  %vm2468_vm2 = vmor (!%p161_p3), %vm471_vm0, %vm472_vm1  ;;  %vm245_vm4 = vsmask.f32 (!%p161_p3), 7440  ;;  %vm1514_vm6 = vcmask (!%p161_p3), 31744   ;;  %vm1539_vm7 = vcmask (!%p161_p3), 64512  }
   0xb   : > { %s2358_s28 = smov (!%p161_p3), 20   ;;  %s2359_s29 = smov (!%p161_p3), 8   ;;  %vm2515_vm5 = vmor (!%p161_p3), %vm244_vm3, %vm245_vm4  ;;  %vm1556_vm8 = vcmask (!%p161_p3), 97280   ;;  %vm1573_vm9 = vcmask (!%p161_p3), 130048   ;;  %vm1590_vm10 = vcmask (!%p161_p3), 162816   ;;  %vm1607_vm11 = vcmask (!%p161_p3), 195584  }
   0xc   : > { %s2360_s30 = smov (!%p161_p3), 4   ;;  %s2361_s8 = smov (!%p161_p3), 16   ;;  %vm1695_vm12 = vcmask (!%p161_p3), 1041408   ;;  %vm1624_vm13 = vcmask (!%p161_p3), 228352   ;;  %vm1641_vm14 = vcmask (!%p161_p3), 261120   ;;  %vm1678_vm15 = vcmask (!%p161_p3), 293888  }
   0xd   : > { %s2362_s9 = smov (!%p161_p3), 28   ;;  %s2363_s10 = smov (!%p161_p3), 32  }
  0x10   : > { %s193_s19 = scalar_select %p192_p5, %s2342_s13, 1 }
  0x12   : > { %s2230_s21 = smul.u32 216, %s193_s19 }
  0x14   : > { %s196_s24 = scalar_lea.vmem %s3192_s0, %s2230_s21 }
  0x15   : > { %s2424_s25 = scalar_lea.vmem %s196_s24, %s2188_s20  ;;  %s2003_s20 = sshll.u32 %s2342_s13, 1 }
  0x16   : > { %v2023_v0 = vld [vmem:[%s2424_s25 + $0x18] sm:$0xf]  ;;  %v2428_v1 = vld [vmem:[%s2424_s25 + $0x1c] sm:$0xf]  ;;  %v2021_v2 = vld [vmem:[%s2424_s25 + $0xc] sm:$0xf]  ;;  %s3148_s21 = sadd.s32 %s2338_s12, %s2003_s20 }
  0x17   : > { %v592_v3 = vshll.u32 %v2428_v1, 16  ;;  %v596_v4 = vshrl.u32 %v2428_v1, 16  ;;  %v2128_v5 = vcombine.low %v2023_v0, %v2428_v1  ;;  %v583_v6 = vshrl.u32 %v2023_v0, 16  ;;  %v2435_v7 = vld [vmem:[%s2424_s25 + $0x10] sm:$0xf]  ;;  %s2004_s22 = sshll.u32 %s3148_s21, 4 }
  0x18   : > { %v586_v8 = vshll.u32 %v2023_v0, 16  ;;  %v568_v9 = vshll.u32 %v2435_v7, 16  ;;  %v572_v10 = vshrl.u32 %v2435_v7, 16  ;;  %v2127_v11 = vcombine.low %v2021_v2, %v2435_v7  ;;  %v2065_v12 = vld [vmem:[%s2424_s25 + $0x24] sm:$0xf]  ;;  %p200_p6 = scmp.lt.s32.totalorder %s2004_s22, 63 }
  0x19   : > { %v2441_v13 = vrot.slane %v596_v4, 4  ;;  %1292 = vrot.lane.b32.xlu1 %v2128_v5, %s2356_s26  ;;  %v585_v14 = vrot.slane %v583_v6, 4  ;;  %v559_v15 = vshrl.u32 %v2021_v2, 16  ;;  %v562_v16 = vshll.u32 %v2021_v2, 16  ;;  %v2445_v17 = vld [vmem:[%s2424_s25 + $0x28] sm:$0xf] }
  0x1a   : > { %v588_v18 = vrot.slane %v586_v8, 5  ;;  %v2447_v19 = vrot.slane %v572_v10, 4  ;;  %1290 = vrot.lane.b32.xlu0 %v2127_v11, %s2356_s26  ;;  %v891_v20 = vshrl.u32 %v2065_v12, 16  ;;  %v894_v21 = vshll.u32 %v2065_v12, 16  ;;  %v2063_v22 = vld [vmem:[%s2424_s25 + $0x18] sm:$0xf] }
  0x1b   : > { %v561_v23 = vrot.slane %v559_v15, 4  ;;  %v564_v24 = vrot.slane %v562_v16, 5  ;;  %v904_v25 = vshrl.u32 %v2445_v17, 16  ;;  %v2152_v26 = vcombine.low %v2065_v12, %v2445_v17  ;;  %v2454_v27 = vld [vmem:[%s2424_s25 + $0x1c] sm:$0xf]  ;;  %s3211_s22 = smov (!%p200_p6, %s2004_s22), 63 }
  0x1c   : > { %v589_v28 = vor.u32 %v588_v18, %v585_v14  ;;  %v2456_v29 = vrot.slane %v891_v20, 4  ;;  %v2458_v30 = vrot.slane %v894_v21, 5  ;;  %v867_v31 = vshrl.u32 %v2063_v22, 16  ;;  %v2461_v32 = vld [vmem:[%s2424_s25 + $0x14] sm:$0x1]  ;;  %s2005_s23 = sshll.u32 %s3211_s22, 3 }
  0x1d   : > { %v565_v33 = vor.u32 %v564_v24, %v561_v23  ;;  %1420 = vrot.lane.b32.xlu1 %v2152_v26, %s2357_s27  ;;  %v870_v34 = vshll.u32 %v2063_v22, 16  ;;  %v880_v35 = vshrl.u32 %v2454_v27, 16  ;;  %v2151_v36 = vcombine.low %v2063_v22, %v2454_v27  ;;  %v2045_v38 = vld [vmem:[%s2424_s25 + $0xc] sm:$0xe]  ;;  %v221_v39 = vld [vmem:[%s2424_s25 + $0x4] sm:$0xf] }
  0x1e   : > { %v2474_v40 = vrot.slane %v589_v28, 4  ;;  %v2476_v41 = vrot.slane %v867_v31, 4  ;;  %v2053_v42 = vrot.slane %v2045_v38, 9  ;;  %v784_v43 = vrot.slane %v2435_v7, 5  ;;  %v236_v44 = vld [vmem:[%s2424_s25 + $0x8] sm:$0x1] }
  0x1f   : > { %v2480_v45 = vrot.slane %v565_v33, 4  ;;  %v2482_v46 = vrot.slane %v870_v34, 5  ;;  %1418 = vrot.lane.b32.xlu0 %v2151_v36, %s2357_s27  ;;  %v787_v47 = vrot.slane %v2461_v32, 5  ;;  %v439_v48 = vld [vmem:[%s2424_s25] sm:$0xe]  ;;  %v476_v49 = vrot.slane %v221_v39, 5 }
  0x20   : > { %v785_v50 = vsel %vm2468_vm2, %v2053_v42, %v784_v43  ;;  %v786_v51 = vrot.slane %v784_v43, 4  ;;  %v2011_v52 = vrot.slane %v439_v48, 9  ;;  %v479_v53 = vrot.slane %v236_v44, 5  ;;  %v223_v54 = vld [vmem:[%s2424_s25 + $0x10] sm:$0xf]  ;;  %p209_p7 = scmp.lt.s32.totalorder %s3148_s21, 3 }
  0x21   : > { %v478_v55 = vrot.slane %v476_v49, 4  ;;  %v237_v56 = vld [vmem:[%s2424_s25 + $0x14] sm:$0x1]  ;;  %v440_v57 = vld [vmem:[%s2424_s25 + $0xc] sm:$0xe]  ;;  %v483_v58 = vrot.slane %v223_v54, 5  ;;  %v897_v59 = vor.u32 %v2458_v30, %v2456_v29  ;;  %v873_v60 = vor.u32 %v2482_v46, %v2476_v41 }
  0x22   : > { %v788_v61 = vsel %vm2468_vm2, %v786_v51, %v787_v47  ;;  %v477_v62 = vsel %vm2468_vm2, %v2011_v52, %v476_v49  ;;  %v2012_v63 = vrot.slane %v440_v57, 9  ;;  %v486_v0 = vrot.slane %v237_v56, 5  ;;  %v220_v2 = vld [vmem:[%s2424_s25] sm:$0xf]  ;;  %v2046_v10 = vld [vmem:[%s2424_s25 + $0x18] sm:$0xe] }
  0x23   : > { %v2143_v4 = vcombine.low %v785_v50, %v788_v61  ;;  %v480_v5 = vsel %vm2468_vm2, %v478_v55, %v479_v53  ;;  %v485_v6 = vrot.slane %v483_v58, 4  ;;  %v248_v8 = vshrl.u32 %v220_v2, 16  ;;  %v2038_v16 = vld [vmem:[%s2424_s25 + $0x20] sm:$0x1]  ;;  %v222_v23 = vld [vmem:[%s2424_s25 + $0xc] sm:$0xf] }
  0x24   : > { %v2119_v11 = vcombine.low %v477_v62, %v480_v5  ;;  %v484_v12 = vsel %vm2468_vm2, %v2012_v63, %v483_v58  ;;  %v251_v14 = vshll.u32 %v220_v2, 16  ;;  %v257_v15 = vshll.u32 %v221_v39, 16  ;;  %v2579_v41 = vld [vmem:[%s2424_s25 + $0x1c] sm:$0xf]  ;;  %s3213_s21 = smov (!%p209_p7, %s3148_s21), 3 }
  0x25   : > { %1370 = vrot.lane.b32.xlu0 %v2143_v4, %s2358_s28  ;;  %v487_v18 = vsel %vm2468_vm2, %v485_v6, %v486_v0  ;;  %v250_v20 = vrot.slane %v248_v8, 4  ;;  %v261_v21 = vshrl.u32 %v221_v39, 16  ;;  %v267_v22 = vshll.u32 %v236_v44, 16  ;;  %v2300_v39 = vld [vmem:[%s3193_s1 + $0x10] ss:$0 sps:$4 sm:$0x33]  }
  0x26   : > { %1242 = vrot.lane.b32.xlu1 %v2119_v11, %s2359_s29  ;;  %v2120_v24 = vcombine.low %v484_v12, %v487_v18  ;;  %v253_v26 = vrot.slane %v251_v14, 5  ;;  %v259_v28 = vrot.slane %v257_v15, 5  ;;  %v2054_v31 = vrot.slane %v2046_v10, 9  ;;  %s2007_s12 = sshll.u32 %s3213_s21, 1 }
  0x27   : > { %v263_v33 = vrot.slane %v261_v21, 4  ;;  %v269_v34 = vrot.slane %v267_v22, 5  ;;  %v791_v36 = vrot.slane %v2428_v1, 5  ;;  %v794_v38 = vrot.slane %v2038_v16, 5  ;;  %v2542_v21 = vld [vmem:[%s2424_s25 + $0x2c] sm:$0x1] }
  0x28   : > { %v254_v42 = vor.u32 %v253_v26, %v250_v20  ;;  %v272_v43 = vshrl.u32 %v222_v23, 16  ;;  %v275_v47 = vshll.u32 %v222_v23, 16  ;;  %v281_v48 = vshll.u32 %v223_v54, 16  ;;  %v2297_v23 = vld [vmem:[%s3193_s1] sm:$0xff]  }
  0x29   : > { %v264_v44 = vor.u32 %v263_v33, %v259_v28  ;;  %v792_v49 = vsel %vm2468_vm2, %v2054_v31, %v791_v36  ;;  %v793_v50 = vrot.slane %v791_v36, 4  ;;  %v285_v51 = vshrl.u32 %v223_v54, 16  ;;  %v2562_v26 = vld [vmem:[%s2424_s25 + $0x20] sm:$0x1]  ;;  %2200 = vmatprep.subr.bf16.mxu0 %v2297_v23  ;;  %2222 = vmatprep.subr.bf16.mxu1 %v2297_v23 }
  0x2a   : > { %1244 = vrot.lane.b32.xlu1 %v2120_v24, %s2359_s29  ;;  %v255_v52 = vrot.slane %v254_v42, 4  ;;  %v274_v53 = vrot.slane %v272_v43, 4  ;;  %v277_v55 = vrot.slane %v275_v47, 5  ;;  %v283_v57 = vrot.slane %v281_v48, 5  ;;  %2201 = vmatpush3.bf16.msra.mxu0 %v2297_v23 }
  0x2b   : > { %v265_v58 = vrot.slane %v264_v44, 4  ;;  %v795_v61 = vsel %vm2468_vm2, %v793_v50, %v794_v38  ;;  %v287_v62 = vrot.slane %v285_v51, 4  ;;  %v291_v63 = vshll.u32 %v237_v56, 16  ;;  %2225 = vmatpush3.bf16.msra.mxu1 %v2297_v23 }
  0x2c   : > { %v260_v0 = vsel %vm2515_vm5, %v255_v52, %v259_v28  ;;  %v2144_v2 = vcombine.low %v792_v49, %v795_v61  ;;  %v278_v4 = vor.u32 %v277_v55, %v274_v53  ;;  %v594_v54 = vrot.slane %v592_v3, 5  ;;  %v224_v28 = vld [vmem:[%s2424_s25 + $0x18] sm:$0xf] }
  0x2d   : > { %v270_v5 = vsel %vm2515_vm5, %v265_v58, %v269_v34  ;;  %v288_v6 = vor.u32 %v287_v62, %v283_v57  ;;  %v293_v8 = vrot.slane %v291_v63, 5  ;;  %v602_v10 = vshll.u32 %v2038_v16, 16  ;;  %v2298_v34 = vld [vmem:[%s3193_s1 + $0x8] sm:$0xff]  }
  0x2e   : > { %v2111_v11 = vcombine.low %v260_v0, %v270_v5  ;;  %1372 = vrot.lane.b32.xlu1 %v2144_v2, %s2358_s28  ;;  %v279_v12 = vrot.slane %v278_v4, 4  ;;  %v595_v56 = vsel %vm2515_vm5, %v2474_v40, %v594_v54  ;;  %v599_v14 = vor.u32 %v2441_v13, %v594_v54  ;;  %2202 = vmatprep.subr.bf16.mxu0 %v2298_v34  ;;  %v226_v0 = vld [vmem:[%s2424_s25 + $0x24] sm:$0xf] }
  0x2f   : > { %v289_v15 = vrot.slane %v288_v6, 4  ;;  %v604_v1 = vrot.slane %v602_v10, 5  ;;  %v570_v3 = vrot.slane %v568_v9, 5  ;;  %v578_v18 = vshll.u32 %v2461_v32, 16  ;;  %2223 = vmatprep.subr.bf16.mxu1 %v2298_v34  ;;  %2203 = vmatpush3.bf16.msra.mxu0 %v2298_v34 }
  0x30   : > { %1202 = vrot.lane.b32.xlu0 %v2111_v11, %s2360_s30  ;;  %v284_v16 = vsel %vm2515_vm5, %v279_v12, %v283_v57  ;;  %v600_v20 = vrot.slane %v599_v14, 4  ;;  %v898_v13 = vrot.slane %v897_v59, 4  ;;  %v900_v7 = vshll.u32 %v2445_v17, 16  ;;  %v2087_v57 = vld [vmem:[%s2424_s25 + $0x18] sm:$0xe]  ;;  %2226 = vmatpush3.bf16.msra.mxu1 %v2298_v34 }
  0x31   : > { %v294_v9 = vsel %vm2515_vm5, %v289_v15, %v293_v8  ;;  %v571_v32 = vsel %vm2515_vm5, %v2480_v45, %v570_v3  ;;  %v575_v40 = vor.u32 %v2447_v19, %v570_v3  ;;  %v580_v22 = vrot.slane %v578_v18, 5  ;;  %v227_v15 = vld [vmem:[%s2424_s25 + $0x28] sm:$0xf]  ;;  %2228 = vmatprep.subr.msk.bf16.mxu0 %vm1695_vm12, %v2300_v39  ;;  %2229 = vmatprep.subr.msk.bf16.mxu1 %vm1695_vm12, %v2300_v39 }
  0x32   : > { %v2112_v24 = vcombine.low %v284_v16, %v294_v9  ;;  %v605_v29 = vsel %vm2515_vm5, %v600_v20, %v604_v1  ;;  %v902_v30 = vrot.slane %v900_v7, 5  ;;  %v906_v59 = vrot.slane %v904_v25, 4 }
  0x33   : > { %v2136_v45 = vcombine.low %v595_v56, %v605_v29  ;;  %v576_v31 = vrot.slane %v575_v40, 4  ;;  %v910_v19 = vshll.u32 %v2542_v21, 16  ;;  %v874_v33 = vrot.slane %v873_v60, 4  ;;  %v2088_v40 = vld [vmem:[%s2424_s25 + $0x24] sm:$0xe] }
  0x34   : > { %1204 = vrot.lane.b32.xlu0 %v2112_v24, %s2360_s30  ;;  %v903_v25 = vsel %vm2515_vm5, %v898_v13, %v902_v30  ;;  %v907_v36 = vor.u32 %v906_v59, %v902_v30  ;;  %v876_v38 = vshll.u32 %v2454_v27, 16  ;;  %v882_v42 = vrot.slane %v880_v35, 4  ;;  %v2586_v35 = vld [vmem:[%s2424_s25 + $0x20] sm:$0x1] }
  0x35   : > { %1332 = vrot.lane.b32.xlu1 %v2136_v45, %s2361_s8  ;;  %v581_v46 = vsel %vm2515_vm5, %v576_v31, %v580_v22  ;;  %v912_v60 = vrot.slane %v910_v19, 5  ;;  %v886_v43 = vshll.u32 %v2562_v26, 16  ;;  %v296_v47 = vshrl.u32 %v224_v28, 16  ;;  %v442_v45 = vld [vmem:[%s2424_s25 + $0x24] sm:$0xe] }
  0x36   : > { %v2135_v48 = vcombine.low %v571_v32, %v581_v46  ;;  %v908_v44 = vrot.slane %v907_v36, 4  ;;  %v878_v49 = vrot.slane %v876_v38, 5  ;;  %v299_v50 = vshll.u32 %v224_v28, 16 }
  0x37   : > { %v888_v51 = vrot.slane %v886_v43, 5  ;;  %v298_v52 = vrot.slane %v296_v47, 4  ;;  %v305_v53 = vshll.u32 %v2579_v41, 16  ;;  %v309_v55 = vshrl.u32 %v2579_v41, 16 }
  0x38   : > { %1330 = vrot.lane.b32.xlu0 %v2135_v48, %s2361_s8  ;;  %v913_v58 = vsel %vm2515_vm5, %v908_v44, %v912_v60  ;;  %v879_v61 = vsel %vm2515_vm5, %v874_v33, %v878_v49  ;;  %v883_v62 = vor.u32 %v882_v42, %v878_v49  ;;  %v301_v63 = vrot.slane %v299_v50, 5  ;;  %v2621_v44 = vld [vmem:[%s2424_s25 + $0x30] sm:$0xf] }
  0x39   : > { %v2160_v2 = vcombine.low %v903_v25, %v913_v58  ;;  %v307_v4 = vrot.slane %v305_v53, 5  ;;  %v311_v54 = vrot.slane %v309_v55, 4  ;;  %v315_v5 = vshll.u32 %v2586_v35, 16  ;;  %v441_v25 = vld [vmem:[%s2424_s25 + $0x18] sm:$0xe] }
  0x3a   : > { %v884_v6 = vrot.slane %v883_v62, 4  ;;  %v302_v8 = vor.u32 %v301_v63, %v298_v52  ;;  %v2095_v10 = vrot.slane %v2087_v57, 9  ;;  %v1092_v11 = vrot.slane %v2454_v27, 5  ;;  %v239_v27 = vld [vmem:[%s2424_s25 + $0x2c] sm:$0x1] }
  0x3b   : > { %1460 = vrot.lane.b32.xlu1 %v2160_v2, %s2362_s9  ;;  %v312_v12 = vor.u32 %v311_v54, %v307_v4  ;;  %v317_v56 = vrot.slane %v315_v5, 5  ;;  %v1095_v14 = vrot.slane %v2562_v26, 5  ;;  %v320_v1 = vshrl.u32 %v226_v0, 16  ;;  %v2028_v62 = vld [vmem:[%s2424_s25 + $0x34] sm:$0xf] }
  0x3c   : > { %v889_v3 = vsel %vm2515_vm5, %v884_v6, %v888_v51  ;;  %v303_v18 = vrot.slane %v302_v8, 4  ;;  %v1093_v16 = vsel %vm2468_vm2, %v2095_v10, %v1092_v11  ;;  %v1094_v20 = vrot.slane %v1092_v11, 4  ;;  %v2644_v5 = vld [vmem:[%s2424_s25 + $0x28] sm:$0xf] }
  0x3d   : > { %v2159_v13 = vcombine.low %v879_v61, %v889_v3  ;;  %v313_v7 = vrot.slane %v312_v12, 4  ;;  %v322_v9 = vrot.slane %v320_v1, 4  ;;  %v323_v32 = vshll.u32 %v226_v0, 16  ;;  %v2025_v0 = vld [vmem:[%s2424_s25 + $0x24] sm:$0xf] }
  0x3e   : > { %v308_v22 = vsel %vm2515_vm5, %v303_v18, %v307_v4  ;;  %v1096_v23 = vsel %vm2468_vm2, %v1094_v20, %v1095_v14  ;;  %v329_v24 = vshll.u32 %v227_v15, 16  ;;  %v333_v29 = vshrl.u32 %v227_v15, 16  ;;  %v2656_v20 = vld [vmem:[%s2424_s25 + $0x2c] sm:$0x1] }
  0x3f   : > { %1458 = vrot.lane.b32.xlu0 %v2159_v13, %s2362_s9  ;;  %v318_v30 = vsel %vm2515_vm5, %v313_v7, %v317_v56  ;;  %v2167_v59 = vcombine.low %v1093_v16, %v1096_v23  ;;  %v325_v26 = vrot.slane %v323_v32, 5  ;;  %v339_v28 = vshll.u32 %v239_v27, 16  ;;  %v2048_v32 = vld [vmem:[%s2424_s25 + $0x30] sm:$0xe] }
  0x40   : > { %v2113_v31 = vcombine.low %v308_v22, %v318_v30  ;;  %v331_v19 = vrot.slane %v329_v24, 5  ;;  %v335_v33 = vrot.slane %v333_v29, 4  ;;  %v2096_v34 = vrot.slane %v2088_v40, 9 }
  0x41   : > { %v326_v36 = vor.u32 %v325_v26, %v322_v9  ;;  %v341_v38 = vrot.slane %v339_v28, 5  ;;  %v1099_v42 = vrot.slane %v2445_v17, 5  ;;  %v1102_v46 = vrot.slane %v2542_v21, 5  ;;  %v2047_v28 = vld [vmem:[%s2424_s25 + $0x24] sm:$0xe] }
  0x42   : > { %1206 = vrot.lane.b32.xlu1 %v2113_v31, %s2360_s30  ;;  %v336_v60 = vor.u32 %v335_v33, %v331_v19  ;;  %v2014_v43 = vrot.slane %v442_v45, 9  ;;  %v497_v47 = vrot.slane %v227_v15, 5  ;;  %v500_v48 = vrot.slane %v239_v27, 5  ;;  %v2040_v15 = vld [vmem:[%s2424_s25 + $0x38] sm:$0x1] }
  0x43   : > { %1498 = vrot.lane.b32.xlu0 %v2167_v59, %s2363_s10  ;;  %v327_v49 = vrot.slane %v326_v36, 4  ;;  %v1100_v50 = vsel %vm2468_vm2, %v2096_v34, %v1099_v42  ;;  %v1101_v17 = vrot.slane %v1099_v42, 4  ;;  %v2013_v21 = vrot.slane %v441_v25, 9 }
  0x44   : > { %v337_v51 = vrot.slane %v336_v60, 4  ;;  %v498_v52 = vsel %vm2468_vm2, %v2014_v43, %v497_v47  ;;  %v499_v53 = vrot.slane %v497_v47, 4  ;;  %v490_v55 = vrot.slane %v2579_v41, 5  ;;  %v2665_v47 = vld [vmem:[%s2424_s25 + $0x3c] sm:$0xf] }
  0x45   : > { %v332_v57 = vsel %vm2515_vm5, %v327_v49, %v331_v19  ;;  %v1103_v58 = vsel %vm2468_vm2, %v1101_v17, %v1102_v46  ;;  %v493_v61 = vrot.slane %v2586_v35, 5  ;;  %v631_v63 = vshrl.u32 %v2621_v44, 16 }
  0x46   : > { %v342_v2 = vsel %vm2515_vm5, %v337_v51, %v341_v38  ;;  %v2168_v4 = vcombine.low %v1100_v50, %v1103_v58  ;;  %v501_v41 = vsel %vm2468_vm2, %v499_v53, %v500_v48  ;;  %v491_v54 = vsel %vm2468_vm2, %v2013_v21, %v490_v55 }
  0x47   : > { %v2114_v6 = vcombine.low %v332_v57, %v342_v2  ;;  %v2122_v35 = vcombine.low %v498_v52, %v501_v41  ;;  %v492_v8 = vrot.slane %v490_v55, 4  ;;  %v633_v10 = vrot.slane %v631_v63, 4  ;;  %v2682_v57 = vld [vmem:[%s2424_s25 + $0x40] sm:$0xf]  ;;  %v2692_v41 = vld [vmem:[%s2424_s25 + $0x34] sm:$0xf] }
  0x48   : > { %1500 = vrot.lane.b32.xlu0 %v2168_v4, %s2363_s10  ;;  %v634_v11 = vshll.u32 %v2621_v44, 16  ;;  %v644_v12 = vshrl.u32 %v2028_v62, 16  ;;  %v2130_v56 = vcombine.low %v2621_v44, %v2028_v62  ;;  %v607_v14 = vshrl.u32 %v2025_v0, 16 }
  0x49   : > { %1208 = vrot.lane.b32.xlu1 %v2114_v6, %s2360_s30  ;;  %v494_v1 = vsel %vm2468_vm2, %v492_v8, %v493_v61  ;;  %v610_v3 = vshll.u32 %v2025_v0, 16  ;;  %v620_v18 = vshrl.u32 %v2644_v5, 16  ;;  %v2129_v16 = vcombine.low %v2025_v0, %v2644_v5 }
  0x4a   : > { %v2121_v27 = vcombine.low %v491_v54, %v494_v1  ;;  %v636_v13 = vrot.slane %v634_v11, 5  ;;  %v609_v7 = vrot.slane %v607_v14, 4  ;;  %v640_v9 = vshll.u32 %v2028_v62, 16 }
  0x4b   : > { %v612_v40 = vrot.slane %v610_v3, 5  ;;  %v646_v22 = vrot.slane %v644_v12, 4  ;;  %v650_v23 = vshll.u32 %v2040_v15, 16  ;;  %v616_v24 = vshll.u32 %v2644_v5, 16 }
  0x4c   : > { %1246 = vrot.lane.b32.xlu0 %v2121_v27, %s2359_s29  ;;  %v637_v29 = vor.u32 %v636_v13, %v633_v10  ;;  %v642_v30 = vrot.slane %v640_v9, 5  ;;  %v622_v59 = vrot.slane %v620_v18, 4  ;;  %v626_v26 = vshll.u32 %v2656_v20, 16  ;;  %v2707_v18 = vld [vmem:[%s2424_s25 + $0x38] sm:$0x1] }
  0x4d   : > { %1248 = vrot.lane.b32.xlu1 %v2122_v35, %s2359_s29  ;;  %v652_v45 = vrot.slane %v650_v23, 5  ;;  %v613_v31 = vor.u32 %v612_v40, %v609_v7  ;;  %v618_v19 = vrot.slane %v616_v24, 5  ;;  %v2056_v33 = vrot.slane %v2048_v32, 9  ;;  %v228_v7 = vld [vmem:[%s2424_s25 + $0x30] sm:$0xf] }
  0x4e   : > { %v638_v34 = vrot.slane %v637_v29, 4  ;;  %v647_v25 = vor.u32 %v646_v22, %v642_v30  ;;  %v628_v36 = vrot.slane %v626_v26, 5  ;;  %v805_v38 = vrot.slane %v2028_v62, 5  ;;  %v2067_v62 = vld [vmem:[%s2424_s25 + $0x30] sm:$0xf] }
  0x4f   : > { %v614_v42 = vrot.slane %v613_v31, 4  ;;  %v623_v46 = vor.u32 %v622_v59, %v618_v19  ;;  %v808_v60 = vrot.slane %v2040_v15, 5  ;;  %v2055_v43 = vrot.slane %v2047_v28, 9  ;;  %v2716_v59 = vld [vmem:[%s2424_s25 + $0x34] sm:$0xf] }
  0x50   : > { %1294 = vrot.lane.b32.xlu0 %v2129_v16, %s2356_s26  ;;  %v643_v48 = vsel %vm2515_vm5, %v638_v34, %v642_v30  ;;  %v648_v44 = vrot.slane %v647_v25, 4  ;;  %v806_v49 = vsel %vm2468_vm2, %v2056_v33, %v805_v38  ;;  %v807_v50 = vrot.slane %v805_v38, 4  ;;  %v2089_v38 = vld [vmem:[%s2424_s25 + $0x30] sm:$0xe] }
  0x51   : > { %1296 = vrot.lane.b32.xlu1 %v2130_v56, %s2356_s26  ;;  %v619_v17 = vsel %vm2515_vm5, %v614_v42, %v618_v19  ;;  %v624_v21 = vrot.slane %v623_v46, 4  ;;  %v798_v51 = vrot.slane %v2644_v5, 5  ;;  %v801_v52 = vrot.slane %v2656_v20, 5  ;;  %v2699_v56 = vld [vmem:[%s2424_s25 + $0x44] sm:$0x1] }
  0x52   : > { %v653_v53 = vsel %vm2515_vm5, %v648_v44, %v652_v45  ;;  %v809_v55 = vsel %vm2468_vm2, %v807_v50, %v808_v60  ;;  %v939_v58 = vshrl.u32 %v2665_v47, 16  ;;  %v942_v61 = vshll.u32 %v2665_v47, 16  ;;  %v2720_v45 = vld [vmem:[%s2424_s25 + $0x38] sm:$0x1] }
  0x53   : > { %v2138_v63 = vcombine.low %v643_v48, %v653_v53  ;;  %v629_v0 = vsel %vm2515_vm5, %v624_v21, %v628_v36  ;;  %v2146_v2 = vcombine.low %v806_v49, %v809_v55  ;;  %v799_v4 = vsel %vm2468_vm2, %v2055_v43, %v798_v51 }
  0x54   : > { %v2137_v54 = vcombine.low %v619_v17, %v629_v0  ;;  %v800_v5 = vrot.slane %v798_v51, 4  ;;  %v941_v6 = vrot.slane %v939_v58, 4  ;;  %v944_v35 = vrot.slane %v942_v61, 5 }
  0x55   : > { %1336 = vrot.lane.b32.xlu1 %v2138_v63, %s2361_s8  ;;  %v952_v8 = vshrl.u32 %v2682_v57, 16  ;;  %v2154_v10 = vcombine.low %v2665_v47, %v2682_v57  ;;  %v915_v11 = vshrl.u32 %v2067_v62, 16  ;;  %v918_v12 = vshll.u32 %v2067_v62, 16 }
  0x56   : > { %1334 = vrot.lane.b32.xlu0 %v2137_v54, %s2361_s8  ;;  %v802_v14 = vsel %vm2468_vm2, %v800_v5, %v801_v52  ;;  %v928_v15 = vshrl.u32 %v2692_v41, 16  ;;  %v2153_v1 = vcombine.low %v2067_v62, %v2692_v41  ;;  %v945_v3 = vor.u32 %v944_v35, %v941_v6  ;;  %v2733_v52 = vld [vmem:[%s2424_s25 + $0x3c] sm:$0xf]  ;;  %v2739_v62 = vld [vmem:[%s2424_s25 + $0x40] sm:$0xf] }
  0x57   : > { %v2145_v16 = vcombine.low %v799_v4, %v802_v14  ;;  %v917_v20 = vrot.slane %v915_v11, 4  ;;  %v920_v27 = vrot.slane %v918_v12, 5  ;;  %v948_v13 = vshll.u32 %v2682_v57, 16  ;;  %v241_v54 = vld [vmem:[%s2424_s25 + $0x44] sm:$0x1] }
  0x58   : > { %v946_v9 = vrot.slane %v945_v3, 4  ;;  %v954_v32 = vrot.slane %v952_v8, 4  ;;  %v958_v40 = vshll.u32 %v2699_v56, 16  ;;  %v924_v22 = vshll.u32 %v2692_v41, 16  ;;  %v2090_v14 = vld [vmem:[%s2424_s25 + $0x3c] sm:$0xe] }
  0x59   : > { %1376 = vrot.lane.b32.xlu1 %v2146_v2, %s2358_s28  ;;  %v950_v23 = vrot.slane %v948_v13, 5  ;;  %v921_v24 = vor.u32 %v920_v27, %v917_v20  ;;  %v930_v29 = vrot.slane %v928_v15, 4  ;;  %v934_v30 = vshll.u32 %v2707_v18, 16 }
  0x5a   : > { %1374 = vrot.lane.b32.xlu0 %v2145_v16, %s2358_s28  ;;  %v960_v26 = vrot.slane %v958_v40, 5  ;;  %v926_v28 = vrot.slane %v924_v22, 5  ;;  %v344_v31 = vshrl.u32 %v228_v7, 16  ;;  %v347_v19 = vshll.u32 %v228_v7, 16  ;;  %v444_v7 = vld [vmem:[%s2424_s25 + $0x3c] sm:$0xe] }
  0x5b   : > { %v951_v33 = vsel %vm2515_vm5, %v946_v9, %v950_v23  ;;  %v955_v34 = vor.u32 %v954_v32, %v950_v23  ;;  %v922_v25 = vrot.slane %v921_v24, 4  ;;  %v936_v36 = vrot.slane %v934_v30, 5  ;;  %v443_v23 = vld [vmem:[%s2424_s25 + $0x30] sm:$0xe] }
  0x5c   : > { %v931_v42 = vor.u32 %v930_v29, %v926_v28  ;;  %v346_v46 = vrot.slane %v344_v31, 4  ;;  %v349_v60 = vrot.slane %v347_v19, 5  ;;  %v353_v43 = vshll.u32 %v2716_v59, 16 }
  0x5d   : > { %1424 = vrot.lane.b32.xlu1 %v2154_v10, %s2357_s27  ;;  %v956_v47 = vrot.slane %v955_v34, 4  ;;  %v927_v48 = vsel %vm2515_vm5, %v922_v25, %v926_v28  ;;  %v357_v44 = vshrl.u32 %v2716_v59, 16  ;;  %v363_v49 = vshll.u32 %v2720_v45, 16  ;;  %v2767_v34 = vld [vmem:[%s2424_s25 + $0x48] sm:$0xf] }
  0x5e   : > { %1422 = vrot.lane.b32.xlu0 %v2153_v1, %s2357_s27  ;;  %v932_v50 = vrot.slane %v931_v42, 4  ;;  %v350_v17 = vor.u32 %v349_v60, %v346_v46  ;;  %v355_v21 = vrot.slane %v353_v43, 5  ;;  %v2097_v51 = vrot.slane %v2089_v38, 9 }
  0x5f   : > { %v961_v53 = vsel %vm2515_vm5, %v956_v47, %v960_v26  ;;  %v359_v55 = vrot.slane %v357_v44, 4  ;;  %v365_v58 = vrot.slane %v363_v49, 5  ;;  %v1106_v61 = vrot.slane %v2692_v41, 5  ;;  %v2032_v44 = vld [vmem:[%s2424_s25 + $0x4c] sm:$0xf] }
  0x60   : > { %v2162_v63 = vcombine.low %v951_v33, %v961_v53  ;;  %v937_v0 = vsel %vm2515_vm5, %v932_v50, %v936_v36  ;;  %v351_v2 = vrot.slane %v350_v17, 4  ;;  %v1109_v4 = vrot.slane %v2707_v18, 5  ;;  %v2029_v50 = vld [vmem:[%s2424_s25 + $0x3c] sm:$0xf]  ;;  %v2790_v53 = vld [vmem:[%s2424_s25 + $0x40] sm:$0xf] }
  0x61   : > { %v2161_v5 = vcombine.low %v927_v48, %v937_v0  ;;  %v360_v6 = vor.u32 %v359_v55, %v355_v21  ;;  %v1107_v35 = vsel %vm2468_vm2, %v2097_v51, %v1106_v61  ;;  %v1108_v8 = vrot.slane %v1106_v61, 4 }
  0x62   : > { %1464 = vrot.lane.b32.xlu1 %v2162_v63, %s2362_s9  ;;  %v356_v41 = vsel %vm2515_vm5, %v351_v2, %v355_v21  ;;  %v368_v10 = vshrl.u32 %v2733_v52, 16  ;;  %v371_v11 = vshll.u32 %v2733_v52, 16  ;;  %v377_v12 = vshll.u32 %v2739_v62, 16 }
  0x63   : > { %1462 = vrot.lane.b32.xlu0 %v2161_v5, %s2362_s9  ;;  %v361_v15 = vrot.slane %v360_v6, 4  ;;  %v1110_v1 = vsel %vm2468_vm2, %v1108_v8, %v1109_v4  ;;  %v381_v3 = vshrl.u32 %v2739_v62, 16  ;;  %v387_v18 = vshll.u32 %v241_v54, 16 }
  0x64   : > { %v2169_v16 = vcombine.low %v1107_v35, %v1110_v1  ;;  %v370_v20 = vrot.slane %v368_v10, 4  ;;  %v373_v27 = vrot.slane %v371_v11, 5  ;;  %v379_v13 = vrot.slane %v377_v12, 5 }
  0x65   : > { %v366_v9 = vsel %vm2515_vm5, %v361_v15, %v365_v58  ;;  %v383_v32 = vrot.slane %v381_v3, 4  ;;  %v389_v40 = vrot.slane %v387_v18, 5  ;;  %v2098_v22 = vrot.slane %v2090_v14, 9  ;;  %v2050_v15 = vld [vmem:[%s2424_s25 + $0x48] sm:$0xe] }
  0x66   : > { %v2115_v24 = vcombine.low %v356_v41, %v366_v9  ;;  %v374_v29 = vor.u32 %v373_v27, %v370_v20  ;;  %v1113_v30 = vrot.slane %v2682_v57, 5  ;;  %v1116_v26 = vrot.slane %v2699_v56, 5  ;;  %v2802_v41 = vld [vmem:[%s2424_s25 + $0x44] sm:$0x1]  ;;  %v2049_v9 = vld [vmem:[%s2424_s25 + $0x3c] sm:$0xe] }
  0x67   : > { %1502 = vrot.lane.b32.xlu0 %v2169_v16, %s2363_s10  ;;  %v384_v28 = vor.u32 %v383_v32, %v379_v13  ;;  %v2016_v31 = vrot.slane %v444_v7, 9  ;;  %v511_v19 = vrot.slane %v2739_v62, 5  ;;  %v514_v33 = vrot.slane %v241_v54, 5  ;;  %v2042_v54 = vld [vmem:[%s2424_s25 + $0x50] sm:$0x1] }
  0x68   : > { %1210 = vrot.lane.b32.xlu1 %v2115_v24, %s2360_s30  ;;  %v375_v25 = vrot.slane %v374_v29, 4  ;;  %v1114_v36 = vsel %vm2468_vm2, %v2098_v22, %v1113_v30  ;;  %v1115_v57 = vrot.slane %v1113_v30, 4  ;;  %v2015_v56 = vrot.slane %v443_v23, 9 }
  0x69   : > { %v385_v38 = vrot.slane %v384_v28, 4  ;;  %v512_v42 = vsel %vm2468_vm2, %v2016_v31, %v511_v19  ;;  %v513_v46 = vrot.slane %v511_v19, 4  ;;  %v504_v60 = vrot.slane %v2716_v59, 5 }
  0x6a   : > { %v380_v43 = vsel %vm2515_vm5, %v375_v25, %v379_v13  ;;  %v1117_v47 = vsel %vm2468_vm2, %v1115_v57, %v1116_v26  ;;  %v507_v48 = vrot.slane %v2720_v45, 5  ;;  %v679_v49 = vshrl.u32 %v2767_v34, 16 }
  0x6b   : > { %v390_v17 = vsel %vm2515_vm5, %v385_v38, %v389_v40  ;;  %v2170_v21 = vcombine.low %v1114_v36, %v1117_v47  ;;  %v515_v59 = vsel %vm2468_vm2, %v513_v46, %v514_v33  ;;  %v505_v51 = vsel %vm2468_vm2, %v2015_v56, %v504_v60 }
  0x6c   : > { %v2116_v55 = vcombine.low %v380_v43, %v390_v17  ;;  %v2124_v45 = vcombine.low %v512_v42, %v515_v59  ;;  %v506_v58 = vrot.slane %v504_v60, 4  ;;  %v681_v61 = vrot.slane %v679_v49, 4 }
  0x6d   : > { %1504 = vrot.lane.b32.xlu0 %v2170_v21, %s2363_s10  ;;  %v682_v63 = vshll.u32 %v2767_v34, 16  ;;  %v692_v0 = vshrl.u32 %v2032_v44, 16  ;;  %v2132_v2 = vcombine.low %v2767_v34, %v2032_v44  ;;  %v655_v4 = vshrl.u32 %v2029_v50, 16  ;;  %v2811_v34 = vld [vmem:[%s2424_s25 + $0x54] sm:$0xf] }
  0x6e   : > { %1212 = vrot.lane.b32.xlu1 %v2116_v55, %s2360_s30  ;;  %v508_v5 = vsel %vm2468_vm2, %v506_v58, %v507_v48  ;;  %v658_v6 = vshll.u32 %v2029_v50, 16  ;;  %v668_v35 = vshrl.u32 %v2790_v53, 16  ;;  %v2131_v8 = vcombine.low %v2029_v50, %v2790_v53  ;;  %v2828_v48 = vld [vmem:[%s2424_s25 + $0x58] sm:$0xf]  ;;  %v2071_v50 = vld [vmem:[%s2424_s25 + $0x48] sm:$0xf] }
  0x6f   : > { %v2123_v10 = vcombine.low %v505_v51, %v508_v5  ;;  %v684_v11 = vrot.slane %v682_v63, 5  ;;  %v657_v12 = vrot.slane %v655_v4, 4  ;;  %v688_v14 = vshll.u32 %v2032_v44, 16 }
  0x70   : > { %v660_v1 = vrot.slane %v658_v6, 5  ;;  %v694_v3 = vrot.slane %v692_v0, 4  ;;  %v698_v18 = vshll.u32 %v2042_v54, 16  ;;  %v664_v16 = vshll.u32 %v2790_v53, 16 }
  0x71   : > { %1250 = vrot.lane.b32.xlu0 %v2123_v10, %s2359_s29  ;;  %v685_v20 = vor.u32 %v684_v11, %v681_v61  ;;  %v690_v27 = vrot.slane %v688_v14, 5  ;;  %v670_v13 = vrot.slane %v668_v35, 4  ;;  %v674_v7 = vshll.u32 %v2802_v41, 16 }
  0x72   : > { %1252 = vrot.lane.b32.xlu1 %v2124_v45, %s2359_s29  ;;  %v700_v32 = vrot.slane %v698_v18, 5  ;;  %v661_v40 = vor.u32 %v660_v1, %v657_v12  ;;  %v666_v22 = vrot.slane %v664_v16, 5  ;;  %v2058_v23 = vrot.slane %v2050_v15, 9  ;;  %v2857_v15 = vld [vmem:[%s2424_s25 + $0x48] sm:$0xf] }
  0x73   : > { %v686_v24 = vrot.slane %v685_v20, 4  ;;  %v695_v29 = vor.u32 %v694_v3, %v690_v27  ;;  %v676_v30 = vrot.slane %v674_v7, 5  ;;  %v819_v26 = vrot.slane %v2032_v44, 5 }
  0x74   : > { %v662_v28 = vrot.slane %v661_v40, 4  ;;  %v671_v31 = vor.u32 %v670_v13, %v666_v22  ;;  %v822_v19 = vrot.slane %v2042_v54, 5  ;;  %v2057_v33 = vrot.slane %v2049_v9, 9  ;;  %v2845_v54 = vld [vmem:[%s2424_s25 + $0x5c] sm:$0x1] }
  0x75   : > { %1298 = vrot.lane.b32.xlu0 %v2131_v8, %s2356_s26  ;;  %v691_v25 = vsel %vm2515_vm5, %v686_v24, %v690_v27  ;;  %v696_v36 = vrot.slane %v695_v29, 4  ;;  %v820_v57 = vsel %vm2468_vm2, %v2058_v23, %v819_v26  ;;  %v821_v56 = vrot.slane %v819_v26, 4  ;;  %v2864_v9 = vld [vmem:[%s2424_s25 + $0x4c] sm:$0xf] }
  0x76   : > { %1300 = vrot.lane.b32.xlu1 %v2132_v2, %s2356_s26  ;;  %v667_v38 = vsel %vm2515_vm5, %v662_v28, %v666_v22  ;;  %v672_v42 = vrot.slane %v671_v31, 4  ;;  %v812_v46 = vrot.slane %v2790_v53, 5  ;;  %v815_v60 = vrot.slane %v2802_v41, 5  ;;  %v2838_v53 = vld [vmem:[%s2424_s25 + $0x4c] sm:$0xf] }
  0x77   : > { %v701_v43 = vsel %vm2515_vm5, %v696_v36, %v700_v32  ;;  %v823_v47 = vsel %vm2468_vm2, %v821_v56, %v822_v19  ;;  %v987_v44 = vshrl.u32 %v2811_v34, 16  ;;  %v990_v49 = vshll.u32 %v2811_v34, 16  ;;  %v2853_v41 = vld [vmem:[%s2424_s25 + $0x50] sm:$0x1]  ;;  %v2091_v31 = vld [vmem:[%s2424_s25 + $0x48] sm:$0xe] }
  0x78   : > { %v2140_v17 = vcombine.low %v691_v25, %v701_v43  ;;  %v677_v21 = vsel %vm2515_vm5, %v672_v42, %v676_v30  ;;  %v2148_v59 = vcombine.low %v820_v57, %v823_v47  ;;  %v813_v51 = vsel %vm2468_vm2, %v2057_v33, %v812_v46  ;;  %v2868_v22 = vld [vmem:[%s2424_s25 + $0x50] sm:$0x1]  ;;  %v2883_v47 = vld [vmem:[%s2424_s25 + $0x54] sm:$0xf] }
  0x79   : > { %v2139_v55 = vcombine.low %v667_v38, %v677_v21  ;;  %v814_v45 = vrot.slane %v812_v46, 4  ;;  %v989_v58 = vrot.slane %v987_v44, 4  ;;  %v992_v61 = vrot.slane %v990_v49, 5  ;;  %v2889_v21 = vld [vmem:[%s2424_s25 + $0x58] sm:$0xf] }
  0x7a   : > { %1340 = vrot.lane.b32.xlu1 %v2140_v17, %s2361_s8  ;;  %v1000_v63 = vshrl.u32 %v2828_v48, 16  ;;  %v2156_v0 = vcombine.low %v2811_v34, %v2828_v48  ;;  %v963_v2 = vshrl.u32 %v2071_v50, 16  ;;  %v966_v4 = vshll.u32 %v2071_v50, 16 }
  0x7b   : > { %1338 = vrot.lane.b32.xlu0 %v2139_v55, %s2361_s8  ;;  %v816_v5 = vsel %vm2468_vm2, %v814_v45, %v815_v60  ;;  %v976_v6 = vshrl.u32 %v2838_v53, 16  ;;  %v2155_v35 = vcombine.low %v2071_v50, %v2838_v53  ;;  %v993_v8 = vor.u32 %v992_v61, %v989_v58  ;;  %v243_v58 = vld [vmem:[%s2424_s25 + $0x5c] sm:$0x1] }
  0x7c   : > { %v2147_v10 = vcombine.low %v813_v51, %v816_v5  ;;  %v965_v11 = vrot.slane %v963_v2, 4  ;;  %v968_v12 = vrot.slane %v966_v4, 5  ;;  %v996_v14 = vshll.u32 %v2828_v48, 16 }
  0x7d   : > { %v994_v1 = vrot.slane %v993_v8, 4  ;;  %v1002_v3 = vrot.slane %v1000_v63, 4  ;;  %v1006_v18 = vshll.u32 %v2845_v54, 16  ;;  %v972_v16 = vshll.u32 %v2838_v53, 16 }
  0x7e   : > { %1380 = vrot.lane.b32.xlu1 %v2148_v59, %s2358_s28  ;;  %v998_v20 = vrot.slane %v996_v14, 5  ;;  %v969_v27 = vor.u32 %v968_v12, %v965_v11  ;;  %v978_v13 = vrot.slane %v976_v6, 4  ;;  %v982_v7 = vshll.u32 %v2853_v41, 16 }
  0x7f   : > { %1378 = vrot.lane.b32.xlu0 %v2147_v10, %s2358_s28  ;;  %v1008_v32 = vrot.slane %v1006_v18, 5  ;;  %v974_v40 = vrot.slane %v972_v16, 5  ;;  %v392_v23 = vshrl.u32 %v2857_v15, 16  ;;  %v395_v24 = vshll.u32 %v2857_v15, 16  ;;  %v446_v18 = vld [vmem:[%s2424_s25 + $0x54] sm:$0xe] }
  0x80   : > { %v999_v29 = vsel %vm2515_vm5, %v994_v1, %v998_v20  ;;  %v1003_v30 = vor.u32 %v1002_v3, %v998_v20  ;;  %v970_v26 = vrot.slane %v969_v27, 4  ;;  %v984_v28 = vrot.slane %v982_v7, 5  ;;  %v445_v7 = vld [vmem:[%s2424_s25 + $0x48] sm:$0xe] }
  0x81   : > { %v979_v19 = vor.u32 %v978_v13, %v974_v40  ;;  %v394_v33 = vrot.slane %v392_v23, 4  ;;  %v397_v34 = vrot.slane %v395_v24, 5  ;;  %v401_v25 = vshll.u32 %v2864_v9, 16 }
  0x82   : > { %1428 = vrot.lane.b32.xlu1 %v2156_v0, %s2357_s27  ;;  %v1004_v36 = vrot.slane %v1003_v30, 4  ;;  %v975_v57 = vsel %vm2515_vm5, %v970_v26, %v974_v40  ;;  %v405_v56 = vshrl.u32 %v2864_v9, 16  ;;  %v411_v38 = vshll.u32 %v2868_v22, 16 }
  0x83   : > { %1426 = vrot.lane.b32.xlu0 %v2155_v35, %s2357_s27  ;;  %v980_v42 = vrot.slane %v979_v19, 4  ;;  %v398_v46 = vor.u32 %v397_v34, %v394_v33  ;;  %v403_v60 = vrot.slane %v401_v25, 5  ;;  %v2099_v43 = vrot.slane %v2091_v31, 9  ;;  %v2092_v35 = vld [vmem:[%s2424_s25 + $0x54] sm:$0xe] }
  0x84   : > { %v1009_v44 = vsel %vm2515_vm5, %v1004_v36, %v1008_v32  ;;  %v407_v49 = vrot.slane %v405_v56, 4  ;;  %v413_v50 = vrot.slane %v411_v38, 5  ;;  %v1120_v17 = vrot.slane %v2838_v53, 5  ;;  %v2917_v31 = vld [vmem:[%s2424_s25 + $0x60] sm:$0xf] }
  0x85   : > { %v2164_v59 = vcombine.low %v999_v29, %v1009_v44  ;;  %v985_v51 = vsel %vm2515_vm5, %v980_v42, %v984_v28  ;;  %v399_v55 = vrot.slane %v398_v46, 4  ;;  %v1123_v45 = vrot.slane %v2853_v41, 5  ;;  %v2033_v44 = vld [vmem:[%s2424_s25 + $0x54] sm:$0xf] }
  0x86   : > { %v2163_v61 = vcombine.low %v975_v57, %v985_v51  ;;  %v408_v63 = vor.u32 %v407_v49, %v403_v60  ;;  %v1121_v0 = vsel %vm2468_vm2, %v2099_v43, %v1120_v17  ;;  %v1122_v2 = vrot.slane %v1120_v17, 4  ;;  %v2942_v51 = vld [vmem:[%s2424_s25 + $0x58] sm:$0xf] }
  0x87   : > { %1468 = vrot.lane.b32.xlu1 %v2164_v59, %s2362_s9  ;;  %v404_v53 = vsel %vm2515_vm5, %v399_v55, %v403_v60  ;;  %v416_v4 = vshrl.u32 %v2883_v47, 16  ;;  %v419_v5 = vshll.u32 %v2883_v47, 16  ;;  %v425_v6 = vshll.u32 %v2889_v21, 16  ;;  %v2036_v60 = vld [vmem:[%s2424_s25 + $0x64] sm:$0xf] }
  0x88   : > { %1466 = vrot.lane.b32.xlu0 %v2163_v61, %s2362_s9  ;;  %v409_v8 = vrot.slane %v408_v63, 4  ;;  %v1124_v41 = vsel %vm2468_vm2, %v1122_v2, %v1123_v45  ;;  %v429_v10 = vshrl.u32 %v2889_v21, 16  ;;  %v435_v11 = vshll.u32 %v243_v58, 16 }
  0x89   : > { %v2171_v12 = vcombine.low %v1121_v0, %v1124_v41  ;;  %v418_v14 = vrot.slane %v416_v4, 4  ;;  %v421_v1 = vrot.slane %v419_v5, 5  ;;  %v427_v3 = vrot.slane %v425_v6, 5  ;;  %v2044_v4 = vld [vmem:[%s2424_s25 + $0x68] sm:$0x1] }
  0x8a   : > { %v414_v16 = vsel %vm2515_vm5, %v409_v8, %v413_v50  ;;  %v431_v20 = vrot.slane %v429_v10, 4  ;;  %v437_v27 = vrot.slane %v435_v11, 5  ;;  %v2100_v13 = vrot.slane %v2092_v35, 9  ;;  %v2958_v10 = vld [vmem:[%s2424_s25 + $0x5c] sm:$0x1] }
  0x8b   : > { %v2117_v32 = vcombine.low %v404_v53, %v414_v16  ;;  %v422_v40 = vor.u32 %v421_v1, %v418_v14  ;;  %v1127_v23 = vrot.slane %v2828_v48, 5  ;;  %v1130_v24 = vrot.slane %v2845_v54, 5  ;;  %v2919_v19 = vpop.permute.xlu1 %1292 }
  0x8c   : > { %1506 = vrot.lane.b32.xlu0 %v2171_v12, %s2363_s10  ;;  %v432_v29 = vor.u32 %v431_v20, %v427_v3  ;;  %v2018_v30 = vrot.slane %v446_v18, 9  ;;  %v525_v26 = vrot.slane %v2889_v21, 5  ;;  %v528_v28 = vrot.slane %v243_v58, 5  ;;  %v2944_v55 = vpop.permute.xlu0 %1290 }
  0x8d   : > { %1214 = vrot.lane.b32.xlu1 %v2117_v32, %s2360_s30  ;;  %v423_v33 = vrot.slane %v422_v40, 4  ;;  %v1128_v48 = vsel %vm2468_vm2, %v2100_v13, %v1127_v23  ;;  %v1129_v54 = vrot.slane %v1127_v23, 4  ;;  %v2017_v34 = vrot.slane %v445_v7, 9  ;;  %v2051_v23 = vld [vmem:[%s2424_s25 + $0x54] sm:$0xe] }
  0x8e   : > { %v433_v25 = vrot.slane %v432_v29, 4  ;;  %v526_v36 = vsel %vm2468_vm2, %v2018_v30, %v525_v26  ;;  %v527_v57 = vrot.slane %v525_v26, 4  ;;  %v518_v56 = vrot.slane %v2864_v9, 5 }
  0x8f   : > { %v428_v38 = vsel %vm2515_vm5, %v423_v33, %v427_v3  ;;  %v1131_v42 = vsel %vm2468_vm2, %v1129_v54, %v1130_v24  ;;  %v521_v46 = vrot.slane %v2868_v22, 5  ;;  %v727_v43 = vshrl.u32 %v2917_v31, 16  ;;  %v2950_v5 = vpop.permute.xlu1 %1420  ;;  %v2052_v3 = vld [vmem:[%s2424_s25 + $0x60] sm:$0xe] }
  0x90   : > { %v438_v49 = vsel %vm2515_vm5, %v433_v25, %v437_v27  ;;  %v2172_v50 = vcombine.low %v1128_v48, %v1131_v42  ;;  %v529_v17 = vsel %vm2468_vm2, %v527_v57, %v528_v28  ;;  %v519_v59 = vsel %vm2468_vm2, %v2017_v34, %v518_v56 }
  0x91   : > { %v2118_v22 = vcombine.low %v428_v38, %v438_v49  ;;  %v2126_v45 = vcombine.low %v526_v36, %v529_v17  ;;  %v520_v58 = vrot.slane %v518_v56, 4  ;;  %v729_v61 = vrot.slane %v727_v43, 4  ;;  %v2965_v24 = vpop.permute.xlu0 %1418  ;;  %v2971_v38 = vld [vmem:[%s2424_s25 + $0x6c] sm:$0xf] }
  0x92   : > { %1508 = vrot.lane.b32.xlu0 %v2172_v50, %s2363_s10  ;;  %v730_v63 = vshll.u32 %v2917_v31, 16  ;;  %v740_v0 = vshrl.u32 %v2036_v60, 16  ;;  %v2134_v2 = vcombine.low %v2917_v31, %v2036_v60  ;;  %v703_v53 = vshrl.u32 %v2033_v44, 16 }
  0x93   : > { %1216 = vrot.lane.b32.xlu1 %v2118_v22, %s2360_s30  ;;  %v522_v6 = vsel %vm2468_vm2, %v520_v58, %v521_v46  ;;  %v706_v35 = vshll.u32 %v2033_v44, 16  ;;  %v716_v8 = vshrl.u32 %v2942_v51, 16  ;;  %v2133_v41 = vcombine.low %v2033_v44, %v2942_v51 }
  0x94   : > { %v2125_v11 = vcombine.low %v519_v59, %v522_v6  ;;  %v732_v12 = vrot.slane %v730_v63, 5  ;;  %v705_v14 = vrot.slane %v703_v53, 4  ;;  %v736_v1 = vshll.u32 %v2036_v60, 16  ;;  %v2075_v63 = vld [vmem:[%s2424_s25 + $0x60] sm:$0xf] }
  0x95   : > { %v708_v18 = vrot.slane %v706_v35, 5  ;;  %v742_v16 = vrot.slane %v740_v0, 4  ;;  %v746_v20 = vshll.u32 %v2044_v4, 16  ;;  %v712_v27 = vshll.u32 %v2942_v51, 16 }
  0x96   : > { %1254 = vrot.lane.b32.xlu0 %v2125_v11, %s2359_s29  ;;  %v733_v13 = vor.u32 %v732_v12, %v729_v61  ;;  %v738_v7 = vrot.slane %v736_v1, 5  ;;  %v718_v32 = vrot.slane %v716_v8, 4  ;;  %v722_v40 = vshll.u32 %v2958_v10, 16 }
  0x97   : > { %1256 = vrot.lane.b32.xlu1 %v2126_v45, %s2359_s29  ;;  %v748_v29 = vrot.slane %v746_v20, 5  ;;  %v709_v30 = vor.u32 %v708_v18, %v705_v14  ;;  %v714_v26 = vrot.slane %v712_v27, 5  ;;  %v2060_v28 = vrot.slane %v2052_v3, 9  ;;  %v2078_v45 = vld [vmem:[%s2424_s25 + $0x70] sm:$0xf]  ;;  %v2991_v0 = vpop.permute.xlu0 %1370 }
  0x98   : > { %v734_v31 = vrot.slane %v733_v13, 4  ;;  %v743_v33 = vor.u32 %v742_v16, %v738_v7  ;;  %v724_v48 = vrot.slane %v722_v40, 5  ;;  %v833_v54 = vrot.slane %v2036_v60, 5  ;;  %v2968_v34 = vpop.permute.xlu1 %1242  ;;  %v2086_v3 = vld [vmem:[%s2424_s25 + $0x74] sm:$0x1] }
  0x99   : > { %v710_v25 = vrot.slane %v709_v30, 4  ;;  %v719_v36 = vor.u32 %v718_v32, %v714_v26  ;;  %v836_v57 = vrot.slane %v2044_v4, 5  ;;  %v2059_v56 = vrot.slane %v2051_v23, 9  ;;  %v2998_v4 = vld [vmem:[%s2424_s25 + $0x64] sm:$0xf] }
  0x9a   : > { %1302 = vrot.lane.b32.xlu0 %v2133_v41, %s2356_s26  ;;  %v739_v42 = vsel %vm2515_vm5, %v734_v31, %v738_v7  ;;  %v744_v46 = vrot.slane %v743_v33, 4  ;;  %v834_v43 = vsel %vm2468_vm2, %v2060_v28, %v833_v54  ;;  %v835_v60 = vrot.slane %v833_v54, 4  ;;  %v2085_v13 = vld [vmem:[%s2424_s25 + $0x68] sm:$0x1] }
  0x9b   : > { %1304 = vrot.lane.b32.xlu1 %v2134_v2, %s2356_s26  ;;  %v715_v44 = vsel %vm2515_vm5, %v710_v25, %v714_v26  ;;  %v720_v49 = vrot.slane %v719_v36, 4  ;;  %v826_v50 = vrot.slane %v2942_v51, 5  ;;  %v829_v17 = vrot.slane %v2958_v10, 5  ;;  %s3154_s26 = scalar_lea.vmem %s3194_s2, %s2005_s23 }
  0x9c   : > { %v749_v59 = vsel %vm2515_vm5, %v744_v46, %v748_v29  ;;  %v837_v22 = vsel %vm2468_vm2, %v835_v60, %v836_v57  ;;  %v1035_v58 = vshrl.u32 %v2971_v38, 16  ;;  %v1038_v61 = vshll.u32 %v2971_v38, 16  ;;  %v3000_v6 = vpop.permute.xlu1 %1244  ;;  %v2094_v29 = vld [vmem:[%s2424_s25 + $0x6c] sm:$0xe] }
  0x9d   : > { %v2142_v2 = vcombine.low %v739_v42, %v749_v59  ;;  %v725_v51 = vsel %vm2515_vm5, %v720_v49, %v724_v48  ;;  %v827_v53 = vsel %vm2468_vm2, %v2059_v56, %v826_v50  ;;  %v828_v8 = vrot.slane %v826_v50, 4 }
  0x9e   : > { %v2141_v35 = vcombine.low %v715_v44, %v725_v51  ;;  %v1037_v41 = vrot.slane %v1035_v58, 4  ;;  %v1040_v10 = vrot.slane %v1038_v61, 5  ;;  %v2150_v11 = vcombine.low %v834_v43, %v837_v22  ;;  %v2093_v43 = vld [vmem:[%s2424_s25 + $0x60] sm:$0xe] }
  0x9f   : > { %1344 = vrot.lane.b32.xlu1 %v2142_v2, %s2361_s8  ;;  %v1048_v12 = vshrl.u32 %v2078_v45, 16  ;;  %v1011_v14 = vshrl.u32 %v2075_v63, 16  ;;  %v1014_v1 = vshll.u32 %v2075_v63, 16  ;;  %v830_v18 = vsel %vm2468_vm2, %v828_v8, %v829_v17 }
  0xa0   : > { %1342 = vrot.lane.b32.xlu0 %v2141_v35, %s2361_s8  ;;  %v2158_v16 = vcombine.low %v2971_v38, %v2078_v45  ;;  %v1024_v20 = vshrl.u32 %v2998_v4, 16  ;;  %v1041_v27 = vor.u32 %v1040_v10, %v1037_v41  ;;  %v2149_v7 = vcombine.low %v827_v53, %v830_v18  ;;  %v3013_v57 = vpop.permute.xlu1 %1372  ;;  %v2306_v41 = vld [vmem:[%s2424_s25 + $0x4] sm:$0xf]  ;;  %v2307_v10 = vld [vmem:[%s2424_s25] sm:$0xf] }
  0xa1   : > { %v1013_v32 = vrot.slane %v1011_v14, 4  ;;  %v1016_v40 = vrot.slane %v1014_v1, 5  ;;  %v1044_v23 = vshll.u32 %v2078_v45, 16  ;;  %v1050_v26 = vrot.slane %v1048_v12, 4 }
  0xa2   : > { %v1042_v30 = vrot.slane %v1041_v27, 4  ;;  %v1054_v28 = vshll.u32 %v2086_v3, 16  ;;  %v1020_v31 = vshll.u32 %v2998_v4, 16  ;;  %v1203_v33 = vpop.permute.xlu0 %1202  ;;  %v1026_v25 = vrot.slane %v1024_v20, 4 }
  0xa3   : > { %1384 = vrot.lane.b32.xlu1 %v2150_v11, %s2358_s28  ;;  %v1046_v48 = vrot.slane %v1044_v23, 5  ;;  %v1017_v54 = vor.u32 %v1016_v40, %v1013_v32  ;;  %v1030_v36 = vshll.u32 %v2085_v13, 16  ;;  %v2157_v56 = vcombine.low %v2075_v63, %v2998_v4  ;;  %v2309_v32 = vld [vmem:[%s2424_s25 + $0xc] sm:$0xf] }
  0xa4   : > { %1382 = vrot.lane.b32.xlu0 %v2149_v7, %s2358_s28  ;;  %v1022_v38 = vrot.slane %v1020_v31, 5  ;;  %v2102_v42 = vrot.slane %v2094_v29, 9  ;;  %v1141_v46 = vrot.slane %v2078_v45, 5  ;;  %v1056_v49 = vrot.slane %v1054_v28, 5  ;;  %v2308_v7 = vld [vmem:[%s2424_s25 + $0x10] sm:$0xf]  ;;  %s212_s28 = scalar_lea.vmem %s3195_s3, %s2007_s12 }
  0xa5   : > { %v1047_v60 = vsel %vm2515_vm5, %v1042_v30, %v1046_v48  ;;  %v1051_v44 = vor.u32 %v1050_v26, %v1046_v48  ;;  %v1018_v50 = vrot.slane %v1017_v54, 4  ;;  %v1032_v59 = vrot.slane %v1030_v36, 5 }
  0xa6   : > { %v1027_v17 = vor.u32 %v1026_v25, %v1022_v38  ;;  %v1143_v22 = vrot.slane %v1141_v46, 4  ;;  %v1144_v58 = vrot.slane %v2086_v3, 5  ;;  %v1205_v61 = vpop.permute.xlu0 %1204  ;;  %v1142_v45 = vsel %vm2468_vm2, %v2102_v42, %v1141_v46 }
  0xa7   : > { %1432 = vrot.lane.b32.xlu1 %v2158_v16, %s2357_s27  ;;  %v1052_v63 = vrot.slane %v1051_v44, 4  ;;  %v2101_v2 = vrot.slane %v2093_v43, 9  ;;  %v1134_v51 = vrot.slane %v2998_v4, 5  ;;  %v1023_v53 = vsel %vm2515_vm5, %v1018_v50, %v1022_v38  ;;  %v1333_v3 = vpop.permute.xlu1 %1332 }
  0xa8   : > { %1430 = vrot.lane.b32.xlu0 %v2157_v56, %s2357_s27  ;;  %v1028_v35 = vrot.slane %v1027_v17, 4  ;;  %v1137_v8 = vrot.slane %v2085_v13, 5  ;;  %v2103_v11 = vcombine.low %v2307_v10, %v2306_v41  ;;  %v1145_v14 = vsel %vm2468_vm2, %v1143_v22, %v1144_v58 }
  0xa9   : > { %v1057_v12 = vsel %vm2515_vm5, %v1052_v63, %v1056_v49  ;;  %v1135_v4 = vsel %vm2468_vm2, %v2101_v2, %v1134_v51  ;;  %v1136_v1 = vrot.slane %v1134_v51, 4  ;;  %v2104_v40 = vcombine.low %v2309_v32, %v2308_v7  ;;  %v2311_v2 = vld [vmem:[%s2424_s25 + $0x1c] sm:$0xf] }
  0xaa   : > { %v2166_v18 = vcombine.low %v1047_v60, %v1057_v12  ;;  %v1033_v16 = vsel %vm2515_vm5, %v1028_v35, %v1032_v59  ;;  %v1517_v13 = vsel %vm1514_vm6, %v2103_v11, %v1203_v33  ;;  %v1331_v23 = vpop.permute.xlu0 %1330  ;;  %v2174_v29 = vcombine.low %v1142_v45, %v1145_v14  ;;  %v2310_v45 = vld [vmem:[%s2424_s25 + $0x18] sm:$0xf]  ;;  %v2312_v11 = vld [vmem:[%s2424_s25 + $0x24] sm:$0xf]  ;;  %v2313_v12 = vld [vmem:[%s2424_s25 + $0x28] sm:$0xf] }
  0xab   : > { %v2165_v20 = vcombine.low %v1023_v53, %v1033_v16  ;;  %v1138_v27 = vsel %vm2468_vm2, %v1136_v1, %v1137_v8  ;;  %v1541_v30 = vsel %vm1539_vm7, %v1517_v13, %v2968_v34  ;;  %v1520_v26 = vsel %vm1514_vm6, %v2104_v40, %v1205_v61 }
  0xac   : > { %1472 = vrot.lane.b32.xlu1 %v2166_v18, %s2362_s9  ;;  %v2173_v37 = vcombine.low %v1135_v4, %v1138_v27  ;;  %v1558_v28 = vsel %vm1556_vm8, %v1541_v30, %v2944_v55  ;;  %v1543_v31 = vsel %vm1539_vm7, %v1520_v26, %v3000_v6  ;;  %v1697_v25 = vsel %vm1695_vm12, %v2300_v39, 0 }
  0xad   : > { %1470 = vrot.lane.b32.xlu0 %v2165_v20, %s2362_s9  ;;  %v1575_v34 = vsel %vm1573_vm9, %v1558_v28, %v1331_v23  ;;  %v1560_v33 = vsel %vm1556_vm8, %v1543_v31, %v2919_v19  ;;  %v1461_v54 = vpop.permute.xlu1 %1460  ;;  %2205 = vmatpush3.bf16.msra.mxu0 %v1697_v25  ;;  %v2110_v36 = vcombine.low %v2883_v47, %v2889_v21 }
  0xae   : > { %v1592_v48 = vsel %vm1590_vm10, %v1575_v34, %v2991_v0  ;;  %v1577_v55 = vsel %vm1573_vm9, %v1560_v33, %v1333_v3  ;;  %v2109_v0 = vcombine.low %v2857_v15, %v2864_v9  ;;  %2227 = vmatpush3.bf16.msra.mxu1 %v1697_v25  ;;  %v2105_v51 = vcombine.low %v2310_v45, %v2311_v2 }
  0xaf   : > { %v1609_v19 = vsel %vm1607_vm11, %v1592_v48, %v2965_v24  ;;  %v1594_v56 = vsel %vm1590_vm10, %v1577_v55, %v3013_v57  ;;  %v2106_v14 = vcombine.low %v2312_v11, %v2313_v12 }
  0xb0   : > { %1512 = vrot.lane.b32.xlu1 %v2174_v29, %s2363_s10  ;;  %v1611_v24 = vsel %vm1607_vm11, %v1594_v56, %v2950_v5  ;;  %v2314_v56 = vld [vmem:[%s2424_s25 + $0x30] sm:$0xf] }
  0xb1   : > { %1510 = vrot.lane.b32.xlu0 %v2173_v37, %s2363_s10  ;;  %v1459_v6 = vpop.permute.xlu0 %1458  ;;  %v1628_v60 = vsel %vm1624_vm13, %v1611_v24, %v1461_v54 }
  0xb2   : > { %v1626_v38 = vsel %vm1624_vm13, %v1609_v19, %v1459_v6 }
  0xb4   : > { %v1207_v42 = vpop.permute.xlu1 %1206 }
  0xb5   : > { %v1499_v46 = vpop.permute.xlu0 %1498  ;;  %v1523_v8 = vsel %vm1514_vm6, %v2105_v51, %v1207_v42 }
  0xb6   : > { %v1643_v43 = vsel %vm1641_vm14, %v1626_v38, %v1499_v46  ;;  %v2315_v38 = vld [vmem:[%s2424_s25 + $0x34] sm:$0xf] }
  0xb7   : > { %2206 = vmatprep.mubr.msk.bf16.mxu0 %vm1678_vm15, %v1643_v43  ;;  %v2107_v42 = vcombine.low %v2314_v56, %v2315_v38 }
  0xba   : > { %v1501_v44 = vpop.permute.xlu0 %1500 }
  0xbb   : > { %v1209_v49 = vpop.permute.xlu1 %1208  ;;  %v1645_v57 = vsel %vm1641_vm14, %v1628_v60, %v1501_v44 }
  0xbc   : > { %2207 = vmatmul.mubr.msk.bf16.vlgmr.msra.gmra.mrb[0].mxu0 %vm1678_vm15, %v1645_v57  ;;  %v1526_v20 = vsel %vm1514_vm6, %v2106_v14, %v1209_v49  ;;  %v2108_v49 = vcombine.low %v2733_v52, %v2739_v62 }
  0xbe   : > { %v1247_v50 = vpop.permute.xlu0 %1246 }
  0xbf   : > { %v1249_v17 = vpop.permute.xlu1 %1248  ;;  %v1545_v41 = vsel %vm1539_vm7, %v1523_v8, %v1247_v50 }
  0xc0   : > { %v1547_v7 = vsel %vm1539_vm7, %v1526_v20, %v1249_v17 }
  0xc2   : > { %v1295_v59 = vpop.permute.xlu0 %1294 }
  0xc3   : > { %v1297_v22 = vpop.permute.xlu1 %1296  ;;  %v1562_v4 = vsel %vm1556_vm8, %v1545_v41, %v1295_v59 }
  0xc4   : > { %v1564_v23 = vsel %vm1556_vm8, %v1547_v7, %v1297_v22 }
  0xc7   : > { %v1337_v58 = vpop.permute.xlu1 %1336 }
  0xc8   : > { %v1335_v61 = vpop.permute.xlu0 %1334  ;;  %v1581_v29 = vsel %vm1573_vm9, %v1564_v23, %v1337_v58 }
  0xc9   : > { %v1579_v3 = vsel %vm1573_vm9, %v1562_v4, %v1335_v61 }
  0xcb   : > { %v1377_v5 = vpop.permute.xlu1 %1376 }
  0xcc   : > { %v1375_v63 = vpop.permute.xlu0 %1374  ;;  %v1598_v30 = vsel %vm1590_vm10, %v1581_v29, %v1377_v5 }
  0xcd   : > { %v1596_v18 = vsel %vm1590_vm10, %v1579_v3, %v1375_v63 }
  0xcf   : > { %v1425_v53 = vpop.permute.xlu1 %1424 }
  0xd0   : > { %v1423_v35 = vpop.permute.xlu0 %1422  ;;  %v1615_v39 = vsel %vm1607_vm11, %v1598_v30, %v1425_v53 }
  0xd1   : > { %v1613_v16 = vsel %vm1607_vm11, %v1596_v18, %v1423_v35 }
  0xd4   : > { %v1465_v10 = vpop.permute.xlu1 %1464 }
  0xd5   : > { %v1463_v1 = vpop.permute.xlu0 %1462  ;;  %v1632_v37 = vsel %vm1624_vm13, %v1615_v39, %v1465_v10 }
  0xd6   : > { %v1630_v27 = vsel %vm1624_vm13, %v1613_v16, %v1463_v1 }
  0xd9   : > { %v1503_v13 = vpop.permute.xlu0 %1502 }
  0xda   : > { %v1211_v32 = vpop.permute.xlu1 %1210  ;;  %v1647_v40 = vsel %vm1641_vm14, %v1630_v27, %v1503_v13 }
  0xdb   : > { %2210 = vmatprep.mubr.msk.bf16.mxu0 %vm1678_vm15, %v1647_v40  ;;  %v1529_v24 = vsel %vm1514_vm6, %v2107_v42, %v1211_v32 }
  0xdf   : > { %v1505_v26 = vpop.permute.xlu0 %1504 }
  0xe0   : > { %v1213_v28 = vpop.permute.xlu1 %1212  ;;  %v1649_v31 = vsel %vm1641_vm14, %v1632_v37, %v1505_v26 }
  0xe1   : > { %2211 = vmatmul.mubr.msk.bf16.gmra.mrb[4].mxu0 %vm1678_vm15, %v1649_v31  ;;  %v1532_v58 = vsel %vm1514_vm6, %v2108_v49, %v1213_v28 }
  0xe3   : > { %v1251_v34 = vpop.permute.xlu0 %1250 }
  0xe4   : > { %v1253_v33 = vpop.permute.xlu1 %1252  ;;  %v1549_v60 = vsel %vm1539_vm7, %v1529_v24, %v1251_v34 }
  0xe5   : > { %v1551_v63 = vsel %vm1539_vm7, %v1532_v58, %v1253_v33 }
  0xe7   : > { %v1299_v48 = vpop.permute.xlu0 %1298 }
  0xe8   : > { %v1301_v54 = vpop.permute.xlu1 %1300  ;;  %v1566_v57 = vsel %vm1556_vm8, %v1549_v60, %v1299_v48 }
  0xe9   : > { %v1568_v52 = vsel %vm1556_vm8, %v1551_v63, %v1301_v54 }
  0xec   : > { %v1341_v25 = vpop.permute.xlu1 %1340 }
  0xed   : > { %v1339_v55 = vpop.permute.xlu0 %1338  ;;  %v1585_v62 = vsel %vm1573_vm9, %v1568_v52, %v1341_v25 }
  0xee   : > { %v1583_v17 = vsel %vm1573_vm9, %v1566_v57, %v1339_v55 }
  0xf0   : > { %v1381_v6 = vpop.permute.xlu1 %1380 }
  0xf1   : > { %v1379_v19 = vpop.permute.xlu0 %1378  ;;  %v1602_v51 = vsel %vm1590_vm10, %v1585_v62, %v1381_v6 }
  0xf2   : > { %v1600_v59 = vsel %vm1590_vm10, %v1583_v17, %v1379_v19 }
  0xf4   : > { %v1429_v46 = vpop.permute.xlu1 %1428 }
  0xf5   : > { %v1427_v43 = vpop.permute.xlu0 %1426  ;;  %v1619_v53 = vsel %vm1607_vm11, %v1602_v51, %v1429_v46 }
  0xf6   : > { %v1617_v22 = vsel %vm1607_vm11, %v1600_v59, %v1427_v43 }
  0xf9   : > { %v1469_v44 = vpop.permute.xlu1 %1468 }
  0xfa   : > { %v1467_v50 = vpop.permute.xlu0 %1466  ;;  %v1636_v35 = vsel %vm1624_vm13, %v1619_v53, %v1469_v44 }
  0xfb   : > { %v1634_v61 = vsel %vm1624_vm13, %v1617_v22, %v1467_v50 }
  0xfe   : > { %v1507_v5 = vpop.permute.xlu0 %1506 }
  0xff   : > { %v1215_v45 = vpop.permute.xlu1 %1214  ;;  %v1651_v2 = vsel %vm1641_vm14, %v1634_v61, %v1507_v5 }
 0x100   : > { %2214 = vmatprep.mubr.msk.bf16.mxu1 %vm1678_vm15, %v1651_v2  ;;  %v1535_v7 = vsel %vm1514_vm6, %v2109_v0, %v1215_v45 }
 0x104   : > { %v1509_v8 = vpop.permute.xlu0 %1508 }
 0x105   : > { %v1217_v41 = vpop.permute.xlu1 %1216  ;;  %v1653_v10 = vsel %vm1641_vm14, %v1636_v35, %v1509_v8 }
 0x106   : > { %2215 = vmatmul.mubr.msk.bf16.vlgmr.msra.gmra.mrb[0].mxu1 %vm1678_vm15, %v1653_v10  ;;  %v1538_v13 = vsel %vm1514_vm6, %v2110_v36, %v1217_v41 }
 0x108   : > { %v1255_v11 = vpop.permute.xlu0 %1254 }
 0x109   : > { %v1257_v12 = vpop.permute.xlu1 %1256  ;;  %v1553_v40 = vsel %vm1539_vm7, %v1535_v7, %v1255_v11 }
 0x10a   : > { %v1555_v32 = vsel %vm1539_vm7, %v1538_v13, %v1257_v12 }
 0x10c   : > { %v1303_v14 = vpop.permute.xlu0 %1302 }
 0x10d   : > { %v1305_v4 = vpop.permute.xlu1 %1304  ;;  %v1570_v30 = vsel %vm1556_vm8, %v1553_v40, %v1303_v14 }
 0x10e   : > { %v1572_v23 = vsel %vm1556_vm8, %v1555_v32, %v1305_v4 }
 0x111   : > { %v1345_v1 = vpop.permute.xlu1 %1344 }
 0x112   : > { %v1343_v3 = vpop.permute.xlu0 %1342  ;;  %v1589_v39 = vsel %vm1573_vm9, %v1572_v23, %v1345_v1 }
 0x113   : > { %v1587_v21 = vsel %vm1573_vm9, %v1570_v30, %v1343_v3 }
 0x115   : > { %v1385_v18 = vpop.permute.xlu1 %1384 }
 0x116   : > { %v1383_v16 = vpop.permute.xlu0 %1382  ;;  %v1606_v15 = vsel %vm1590_vm10, %v1589_v39, %v1385_v18 }
 0x117   : > { %v1604_v9 = vsel %vm1590_vm10, %v1587_v21, %v1383_v16 }
 0x119   : > { %v1433_v20 = vpop.permute.xlu1 %1432 }
 0x11a   : > { %v1431_v27 = vpop.permute.xlu0 %1430  ;;  %v1623_v0 = vsel %vm1607_vm11, %v1606_v15, %v1433_v20 }
 0x11b   : > { %v1621_v36 = vsel %vm1607_vm11, %v1604_v9, %v1431_v27 }
 0x11e   : > { %v1473_v29 = vpop.permute.xlu1 %1472 }
 0x11f   : > { %v1471_v47 = vpop.permute.xlu0 %1470  ;;  %v1640_v37 = vsel %vm1624_vm13, %v1623_v0, %v1473_v29 }
 0x120   : > { %v1638_v28 = vsel %vm1624_vm13, %v1621_v36, %v1471_v47 }
 0x122   : > { %v1513_v26 = vpop.permute.xlu1 %1512 }
 0x123   : > { %v1657_v31 = vsel %vm1641_vm14, %v1640_v37, %v1513_v26  ;;  %v1511_v34 = vpop.permute.xlu0 %1510 }
 0x124   : > { %v1655_v33 = vsel %vm1641_vm14, %v1638_v28, %v1511_v34 }
 0x125   : > { %2218 = vmatprep.mubr.msk.bf16.mxu1 %vm1678_vm15, %v1655_v33 }
 0x126   : > { %2219 = vmatmul.mubr.msk.bf16.gmra.mrb[4].mxu1 %vm1678_vm15, %v1657_v31 }
 0x18f   : > { %v2208_v48 = vpop.f32.mrb[0].mxu0 }
 0x190   : > { %1798 = vst [vmem:[%s3154_s26 + $0x10] sm:$0xff] %v2208_v48  ;;  %v1733_v54 = vpop.f32.mrb[1].mxu0  ;;  %v1836_v38 = vmul.f32 %v2208_v48, %v2208_v48 }
 0x191   : > { %1796 = vst [vmem:[%s3154_s26] sm:$0xff] %v1733_v54  ;;  %v2209_v25 = vpop.f32.mrb[2].mxu0  ;;  %v1834_v6 = vmul.f32 %v1733_v54, %v1733_v54 }
 0x192   : > { %1799 = vst [vmem:[%s3154_s26 + $0x18] sm:$0xff] %v2209_v25  ;;  %v1736_v55 = vpop.f32.mrb[3].mxu0  ;;  %v1837_v43 = vmul.f32 %v2209_v25, %v2209_v25 }
 0x193   : > { %1797 = vst [vmem:[%s3154_s26 + $0x8] sm:$0xff] %v1736_v55  ;;  %v1812_v19 = vadd.f32 %v1736_v55, %v1733_v54  ;;  %v1835_v56 = vmul.f32 %v1736_v55, %v1736_v55 }
 0x195   : > { %v1813_v42 = vadd.f32 %v2208_v48, %v1812_v19  ;;  %v1850_v46 = vadd.f32 %v1835_v56, %v1834_v6 }
 0x197   : > { %v1851_v24 = vadd.f32 %v1850_v46, %v1836_v38  ;;  %v1814_v60 = vadd.f32 %v2209_v25, %v1813_v42 }
 0x199   : > { %v1852_v44 = vadd.f32 %v1851_v24, %v1837_v43 }
 0x1b4   : > { %v2212_v49 = vpop.f32.mrb[4].mxu0 }
 0x1b5   : > { %1802 = vst [vmem:[%s3154_s26 + $0x30] sm:$0xff] %v2212_v49  ;;  %v1749_v57 = vpop.f32.mrb[5].mxu0  ;;  %v1840_v63 = vmul.f32 %v2212_v49, %v2212_v49 }
 0x1b6   : > { %1800 = vst [vmem:[%s3154_s26 + $0x20] sm:$0xff] %v1749_v57  ;;  %v1815_v50 = vadd.f32 %v1814_v60, %v1749_v57  ;;  %v1838_v17 = vmul.f32 %v1749_v57, %v1749_v57  ;;  %v2213_v59 = vpop.f32.mrb[6].mxu0 }
 0x1b7   : > { %1803 = vst [vmem:[%s3154_s26 + $0x38] sm:$0xff] %v2213_v59  ;;  %v1752_v22 = vpop.f32.mrb[7].mxu0  ;;  %v1841_v52 = vmul.f32 %v2213_v59, %v2213_v59 }
 0x1b8   : > { %v1853_v58 = vadd.f32 %v1852_v44, %v1838_v17  ;;  %1801 = vst [vmem:[%s3154_s26 + $0x28] sm:$0xff] %v1752_v22  ;;  %v1816_v61 = vadd.f32 %v1815_v50, %v1752_v22  ;;  %v1839_v5 = vmul.f32 %v1752_v22, %v1752_v22 }
 0x1ba   : > { %v1817_v45 = vadd.f32 %v2212_v49, %v1816_v61  ;;  %v1854_v2 = vadd.f32 %v1853_v58, %v1839_v5 }
 0x1bc   : > { %v1855_v62 = vadd.f32 %v1854_v2, %v1840_v63  ;;  %v1818_v51 = vadd.f32 %v2213_v59, %v1817_v45 }
 0x1be   : > { %v1856_v53 = vadd.f32 %v1855_v62, %v1841_v52 }
 0x1d9   : > { %v2216_v35 = vpop.f32.mrb[0].mxu1 }
 0x1da   : > { %1806 = vst [vmem:[%s3154_s26 + $0x50] sm:$0xff] %v2216_v35  ;;  %v1765_v8 = vpop.f32.mrb[1].mxu1  ;;  %v1844_v3 = vmul.f32 %v2216_v35, %v2216_v35 }
 0x1db   : > { %1804 = vst [vmem:[%s3154_s26 + $0x40] sm:$0xff] %v1765_v8  ;;  %v1819_v41 = vadd.f32 %v1818_v51, %v1765_v8  ;;  %v1842_v10 = vmul.f32 %v1765_v8, %v1765_v8  ;;  %v2217_v11 = vpop.f32.mrb[2].mxu1 }
 0x1dc   : > { %1807 = vst [vmem:[%s3154_s26 + $0x58] sm:$0xff] %v2217_v11  ;;  %v1768_v12 = vpop.f32.mrb[3].mxu1  ;;  %v1845_v20 = vmul.f32 %v2217_v11, %v2217_v11 }
 0x1dd   : > { %v1857_v14 = vadd.f32 %v1856_v53, %v1842_v10  ;;  %1805 = vst [vmem:[%s3154_s26 + $0x48] sm:$0xff] %v1768_v12  ;;  %v1820_v4 = vadd.f32 %v1819_v41, %v1768_v12  ;;  %v1843_v1 = vmul.f32 %v1768_v12, %v1768_v12 }
 0x1df   : > { %v1821_v18 = vadd.f32 %v2216_v35, %v1820_v4  ;;  %v1858_v16 = vadd.f32 %v1857_v14, %v1843_v1 }
 0x1e1   : > { %v1859_v27 = vadd.f32 %v1858_v16, %v1844_v3  ;;  %v1822_v13 = vadd.f32 %v2217_v11, %v1821_v18 }
 0x1e3   : > { %v1860_v7 = vadd.f32 %v1859_v27, %v1845_v20 }
 0x1f9   : > { %v2220_v32 = vpop.f32.mrb[4].mxu1 }
 0x1fa   : > { %1810 = vst [vmem:[%s3154_s26 + $0x70] sm:$0xff] %v2220_v32  ;;  %v1781_v40 = vpop.f32.mrb[5].mxu1  ;;  %v1848_v9 = vmul.f32 %v2220_v32, %v2220_v32 }
 0x1fb   : > { %1808 = vst [vmem:[%s3154_s26 + $0x60] sm:$0xff] %v1781_v40  ;;  %v1823_v23 = vadd.f32 %v1822_v13, %v1781_v40  ;;  %v1846_v29 = vmul.f32 %v1781_v40, %v1781_v40  ;;  %v2221_v30 = vpop.f32.mrb[6].mxu1 }
 0x1fc   : > { %1811 = vst [vmem:[%s3154_s26 + $0x78] sm:$0xff] %v2221_v30  ;;  %v1784_v39 = vpop.f32.mrb[7].mxu1  ;;  %v1849_v37 = vmul.f32 %v2221_v30, %v2221_v30 }
 0x1fd   : > { %v1861_v47 = vadd.f32 %v1860_v7, %v1846_v29  ;;  %1809 = vst [vmem:[%s3154_s26 + $0x68] sm:$0xff] %v1784_v39  ;;  %v1824_v21 = vadd.f32 %v1823_v23, %v1784_v39  ;;  %v1847_v15 = vmul.f32 %v1784_v39, %v1784_v39 }
 0x1ff   : > { %v1825_v0 = vadd.f32 %v2220_v32, %v1824_v21  ;;  %v1862_v36 = vadd.f32 %v1861_v47, %v1847_v15 }
 0x201   : > { %v1826_v26 = vadd.f32 %v2221_v30, %v1825_v0  ;;  %v1863_v28 = vadd.f32 %v1862_v36, %v1848_v9 }
 0x203   : > { %v1827_v31 = vrot.slane %v1826_v26, 4  ;;  %v1864_v34 = vadd.f32 %v1863_v28, %v1849_v37 }
 0x205   : > { %v1828_v33 = vadd.f32 %v1827_v31, %v1826_v26  ;;  %v1865_v48 = vrot.slane %v1864_v34, 4 }
 0x207   : > { %v1829_v54 = vrot.slane %v1828_v33, 2  ;;  %v1866_v25 = vadd.f32 %v1865_v48, %v1864_v34 }
 0x209   : > { %v1830_v55 = vadd.f32 %v1829_v54, %v1828_v33  ;;  %v1867_v6 = vrot.slane %v1866_v25, 2 }
 0x20b   : > { %v1831_v19 = vrot.slane %v1830_v55, 1  ;;  %v1868_v56 = vadd.f32 %v1867_v6, %v1866_v25 }
 0x20d   : > { %v1832_v38 = vadd.f32 %v1831_v19, %v1830_v55  ;;  %v1869_v42 = vrot.slane %v1868_v56, 1 }
 0x20f   : > { %1833 = vst [vmem:[%s212_s28] sm:$0x1] %v1832_v38  ;;  %v1870_v46 = vadd.f32 %v1869_v42, %v1868_v56 }
 0x211   : > { %1871 = vst [vmem:[%s212_s28 + $0x1] sm:$0x1] %v1870_v46 }
 0x212 PF: > { %s14_s16 = sadd.s32 1, %s2354_s16   ;;  %s3200_s12 = smov %s2346_s14 }
 0x213   : > { %p11_p8 = scmp.ge.s32.totalorder %s14_s16, 6   ;;  %s3201_s13 = smov %s2350_s15 }
 0x214   : > { %s3202_s14 = smov %s3205_s17  ;;  %s3203_s15 = smov %s3209_s18 }
 0x215   :  { %13 = sbr.rel (!%p11_p8) target bundleno = 3 (0x3), region = 73 }

</bundles_post_ra>
